<compile_context>
chip_gen: v6e
topology: v6e:2x2x1
jax: 0.10.0
libtpu: 0.0.40
codegen_flags: <defaults>
</compile_context>

<pallas_src>
import functools

import jax
import jax.numpy as jnp
from jax.experimental import pallas as pl
from jax.experimental.pallas import tpu as pltpu

_SQRT_2_OVER_PI = 0.7978845608028654

# Row layout of the packed element-wise parameter array (see seam_forward):
#   rows 0..8 : depthwise 3x3 taps (kh*3 + kw), tiled over W
#   row  9    : depthwise conv bias
#   row 10/11 : BN1 scale / shift (eval-mode affine)
#   row 12    : pointwise (1x1) conv bias
_ROW_DWB = 9
_ROW_BN1S = 10
_ROW_BN1B = 11
_ROW_PWB = 12


def _gelu(x):
    # TODO(synk): PyTorch nn.GELU() defaults to the exact erf formulation; erf has
    # no guaranteed Mosaic lowering, so the tanh approximation is used in-kernel.
    return 0.5 * x * (1.0 + jnp.tanh(_SQRT_2_OVER_PI * (x + 0.044715 * x * x * x)))


def _seam_kernel(x_ref, ep_ref, wd_ref, fc1d_ref, fc1c_ref, fc2d_ref, out_ref,
                 *, H, W, C):
    WC = W * C
    x = x_ref[0]                                              # (H, W*C), lane-dense

    lane = jax.lax.broadcasted_iota(jnp.int32, (H, WC), 1)
    row = jax.lax.broadcasted_iota(jnp.int32, (H, WC), 0)

    # ---- depthwise 3x3 conv (stride=1, padding=1, groups=C) -----------------
    # Halo handled with circular rolls + zero masks: a W shift is +/-C lanes,
    # an H shift is +/-1 sublane row.  (roll == jnp.roll semantics.)
    x_wshift = (
        jnp.where(lane >= C, pltpu.roll(x, C, axis=1), 0.0),               # dw = -1
        x,                                                                 # dw =  0
        jnp.where(lane < (W - 1) * C, pltpu.roll(x, WC - C, axis=1), 0.0), # dw = +1
    )

    acc = jnp.zeros((H, WC), jnp.float32)
    for kh in range(3):
        dh = kh - 1
        for kw in range(3):
            xs = x_wshift[kw]
            if dh == -1:
                xs = jnp.where(row >= 1, pltpu.roll(xs, 1, axis=0), 0.0)
            elif dh == 1:
                xs = jnp.where(row < H - 1, pltpu.roll(xs, H - 1, axis=0), 0.0)
            tap = kh * 3 + kw
            acc = acc + xs * ep_ref[tap:tap + 1, :]            # (H,WC) * (1,WC)
    acc = acc + ep_ref[_ROW_DWB:_ROW_DWB + 1, :]               # conv bias

    # ---- GELU -> BN1 (eval-mode affine) -> residual add ---------------------
    r = (_gelu(acc) * ep_ref[_ROW_BN1S:_ROW_BN1S + 1, :]
         + ep_ref[_ROW_BN1B:_ROW_BN1B + 1, :] + x)

    # ---- 1x1 conv as a lane-dense block-diagonal matmul (MXU) ---------------
    z = (jnp.dot(r, wd_ref[...], preferred_element_type=jnp.float32)
         + ep_ref[_ROW_PWB:_ROW_PWB + 1, :])
    g = _gelu(z)

    # ---- global average pool (BN2 + 1/(H*W) folded into fc1d / fc1c) --------
    row_sum = jnp.sum(g, axis=0, keepdims=True)                # (1, W*C)

    # ---- SE fc: Linear -> ReLU -> Linear -> Sigmoid, then exp ---------------
    h = jnp.maximum(
        jnp.dot(row_sum, fc1d_ref[...], preferred_element_type=jnp.float32)
        + fc1c_ref[...], 0.0)                                  # (1, mid)
    s = jax.nn.sigmoid(
        jnp.dot(h, fc2d_ref[...], preferred_element_type=jnp.float32))  # (1, W*C)
    scale = jnp.exp(s)

    # ---- apply per-channel scale to the ORIGINAL input (lane-dense store) ---
    out_ref[0] = x * scale


def seam_forward(x_nchw, params):
    """x_nchw: (B, C, H, W) float32.  params: see init_params."""
    B, C, H, W = x_nchw.shape
    dww, dwb, bn1s, bn1b, pw_wT, pwb, bn2s, bn2b, fc1, fc2 = params
    WC = W * C

    # NCHW -> NHWC -> lane-dense (B, H, W*C).  Contiguous reshape, no extra pass.
    x = jnp.transpose(x_nchw, (0, 2, 3, 1)).astype(jnp.float32).reshape(B, H, WC)

    # Pack every per-channel vector into a single lane-dense (13, W*C) array.
    tile_w = lambda v: jnp.tile(v.reshape(1, C).astype(jnp.float32), (1, W))
    ep = jnp.concatenate(
        [jnp.tile(dww.astype(jnp.float32), (1, W)),            # rows 0..8
         tile_w(dwb), tile_w(bn1s), tile_w(bn1b), tile_w(pwb)], axis=0)

    # 1x1 conv as block-diagonal (W*C, W*C) weight so the matmul stays lane-dense.
    # NOTE: intended for small C (< 128).  For production SEAM shapes (C >= 128,
    # large H*W) use a plain (H*W, C) @ (C, C) matmul with H-tiling (1-row halo)
    # and a two-pass global pool to stay inside v7x's 64 MiB VMEM.
    wd = jnp.kron(jnp.eye(W, dtype=jnp.float32), pw_wT.astype(jnp.float32))

    # Fold BN2 (eval affine) and the average-pool 1/(H*W) into the SE fc1.
    fc1d = jnp.tile(fc1 * bn2s.reshape(C, 1), (W, 1)) / float(H * W)   # (W*C, mid)
    fc1c = bn2b.reshape(1, C) @ fc1                                    # (1, mid)
    fc2d = jnp.tile(fc2, (1, W))                                       # (mid, W*C)

    kernel = functools.partial(_seam_kernel, H=H, W=W, C=C)

    def const_spec(a):
        nd = a.ndim
        return pl.BlockSpec(a.shape, lambda b: (0,) * nd)

    out = pl.pallas_call(
        kernel,
        out_shape=jax.ShapeDtypeStruct((B, H, WC), jnp.float32),
        grid=(B,),  # B parallel steps -> both v7x TensorCores get work for B >= 2
        in_specs=[
            pl.BlockSpec((1, H, WC), lambda b: (b, 0, 0)),
            const_spec(ep), const_spec(wd), const_spec(fc1d),
            const_spec(fc1c), const_spec(fc2d),
        ],
        out_specs=pl.BlockSpec((1, H, WC), lambda b: (b, 0, 0)),
        compiler_params=pltpu.CompilerParams(dimension_semantics=("parallel",)),
    )(x, ep, wd, fc1d, fc1c, fc2d)

    return jnp.transpose(out.reshape(B, H, W, C), (0, 3, 1, 2))   # -> NCHW


def init_params(key, C, reduction=16, eps=1e-5):
    """Deterministic synthetic parameters mirroring SEAM.__init__ shapes/inits."""
    mid = max(C // reduction, 1)
    k0, k1, k2, k3, k4, k5 = jax.random.split(key, 6)

    # depthwise Conv2d(C, C, 3, groups=C): weight (C,1,3,3); xavier-uniform-like.
    # Stored here as (kh*kw, C); real PyTorch weights would need a permute.
    lim_dw = (6.0 / (9 + 9)) ** 0.5
    dw_w = jax.random.uniform(k0, (3, 3, C), jnp.float32, -lim_dw, lim_dw).reshape(9, C)
    dw_b = jax.random.uniform(k1, (1, C), jnp.float32, -1.0 / 3.0, 1.0 / 3.0)

    # pointwise Conv2d(C, C, 1): weight (C,C,1,1); xavier-uniform; stored as (in, out)
    lim_pw = (6.0 / (C + C)) ** 0.5
    pw_w = jax.random.uniform(k2, (C, C), jnp.float32, -lim_pw, lim_pw)   # (out, in)
    pw_wT = pw_w.T                                                        # (in, out)
    b_pw = 1.0 / (C ** 0.5)
    pw_b = jax.random.uniform(k3, (1, C), jnp.float32, -b_pw, b_pw)

    # BatchNorm2d eval mode: gamma=1, beta=0, mean=0, var=1 -> affine form
    bn_scale = jnp.full((1, C), 1.0 / (1.0 + eps) ** 0.5, jnp.float32)
    bn_shift = jnp.zeros((1, C), jnp.float32)

    # fc: Linear(C, mid, bias=False), Linear(mid, C, bias=False); normal(0, 0.001)
    fc1 = (0.001 * jax.random.normal(k4, (mid, C), jnp.float32)).T   # (C, mid)
    fc2 = (0.001 * jax.random.normal(k5, (C, mid), jnp.float32)).T   # (mid, C)

    return (dw_w, dw_b, bn_scale, bn_shift, pw_wT, pw_b, bn_scale, bn_shift, fc1, fc2)


if __name__ == "__main__":
    key = jax.random.PRNGKey(0)
    kx, kp = jax.random.split(key)

    # c1=32 with reduction=16 -> hidden dim 2 in the SE fc.
    B, C, H, W = 2, 32, 16, 16
    x = jax.random.normal(kx, (B, C, H, W), jnp.float32)   # PyTorch NCHW input
    params = init_params(kp, C)

    y = seam_forward(x, params)
    jax.block_until_ready(y)
    assert y.shape == (B, C, H, W) and y.dtype == jnp.float32
    print("KERNEL_OK")
</pallas_src>

<mosaic_0001>
module attributes {stable_mosaic.version = 11 : i64} {
  func.func @_seam_kernel(%arg0: i32, %arg1: memref<1x16x512xf32, #tpu.memory_space<vmem>>, %arg2: memref<13x512xf32, #tpu.memory_space<vmem>>, %arg3: memref<512x512xf32, #tpu.memory_space<vmem>>, %arg4: memref<512x2xf32, #tpu.memory_space<vmem>>, %arg5: memref<1x2xf32, #tpu.memory_space<vmem>>, %arg6: memref<2x512xf32, #tpu.memory_space<vmem>>, %arg7: memref<1x16x512xf32, #tpu.memory_space<vmem>>) attributes {dimension_semantics = [#tpu.dimension_semantics<parallel>], iteration_bounds = array<i64: 2>, scalar_prefetch = 0 : i64, scratch_operands = 0 : i64, tpu.core_type = #tpu.core_type<tc>, window_params = [{transform_indices = @transform_0, window_bounds = array<i64: 1, 16, 512>}, {pipeline_mode = #tpu.pipeline_mode<synchronous>, transform_indices = @transform_1, window_bounds = array<i64: 13, 512>}, {pipeline_mode = #tpu.pipeline_mode<synchronous>, transform_indices = @transform_2, window_bounds = array<i64: 512, 512>}, {pipeline_mode = #tpu.pipeline_mode<synchronous>, transform_indices = @transform_3, window_bounds = array<i64: 512, 2>}, {pipeline_mode = #tpu.pipeline_mode<synchronous>, transform_indices = @transform_4, window_bounds = array<i64: 1, 2>}, {pipeline_mode = #tpu.pipeline_mode<synchronous>, transform_indices = @transform_5, window_bounds = array<i64: 2, 512>}, {transform_indices = @transform_6, window_bounds = array<i64: 1, 16, 512>}]} {
    %c0 = arith.constant 0 : index
    %c0_0 = arith.constant 0 : index
    %c0_1 = arith.constant 0 : index
    %0 = vector.load %arg1[%c0, %c0_0, %c0_1] : memref<1x16x512xf32, #tpu.memory_space<vmem>>, vector<1x16x512xf32>
    %1 = vector.shape_cast %0 : vector<1x16x512xf32> to vector<16x512xf32>
    %2 = tpu.iota {dimensions = array<i32: 1>} : vector<16x512xi32>
    %3 = tpu.iota {dimensions = array<i32: 0>} : vector<16x512xi32>
    %c32_i32 = arith.constant 32 : i32
    %4 = vector.broadcast %c32_i32 : i32 to vector<16x512xi32>
    %5 = arith.cmpi sge, %2, %4 : vector<16x512xi32>
    %c32_i32_2 = arith.constant 32 : i32
    %6 = tpu.dynamic_rotate %1 by %c32_i32_2 dim 1 : vector<16x512xf32>, i32 -> vector<16x512xf32>
    %cst = arith.constant 0.000000e+00 : f32
    %7 = vector.broadcast %cst : f32 to vector<16x512xf32>
    %8 = arith.select %5, %6, %7 : vector<16x512xi1>, vector<16x512xf32>
    %c480_i32 = arith.constant 480 : i32
    %9 = vector.broadcast %c480_i32 : i32 to vector<16x512xi32>
    %10 = arith.cmpi slt, %2, %9 : vector<16x512xi32>
    %c480_i32_3 = arith.constant 480 : i32
    %11 = tpu.dynamic_rotate %1 by %c480_i32_3 dim 1 : vector<16x512xf32>, i32 -> vector<16x512xf32>
    %cst_4 = arith.constant 0.000000e+00 : f32
    %12 = vector.broadcast %cst_4 : f32 to vector<16x512xf32>
    %13 = arith.select %10, %11, %12 : vector<16x512xi1>, vector<16x512xf32>
    %cst_5 = arith.constant 0.000000e+00 : f32
    %14 = vector.broadcast %cst_5 : f32 to vector<16x512xf32>
    %c1_i32 = arith.constant 1 : i32
    %15 = vector.broadcast %c1_i32 : i32 to vector<16x512xi32>
    %16 = arith.cmpi sge, %3, %15 : vector<16x512xi32>
    %c1_i32_6 = arith.constant 1 : i32
    %17 = tpu.dynamic_rotate %8 by %c1_i32_6 dim 0 : vector<16x512xf32>, i32 -> vector<16x512xf32>
    %cst_7 = arith.constant 0.000000e+00 : f32
    %18 = vector.broadcast %cst_7 : f32 to vector<16x512xf32>
    %19 = arith.select %16, %17, %18 : vector<16x512xi1>, vector<16x512xf32>
    %c0_8 = arith.constant 0 : index
    %c0_9 = arith.constant 0 : index
    %20 = vector.load %arg2[%c0_8, %c0_9] : memref<13x512xf32, #tpu.memory_space<vmem>>, vector<1x512xf32>
    %21 = vector.broadcast %20 : vector<1x512xf32> to vector<16x512xf32>
    %22 = arith.mulf %19, %21 : vector<16x512xf32>
    %23 = arith.addf %14, %22 : vector<16x512xf32>
    %c1_i32_10 = arith.constant 1 : i32
    %24 = vector.broadcast %c1_i32_10 : i32 to vector<16x512xi32>
    %25 = arith.cmpi sge, %3, %24 : vector<16x512xi32>
    %c1_i32_11 = arith.constant 1 : i32
    %26 = tpu.dynamic_rotate %1 by %c1_i32_11 dim 0 : vector<16x512xf32>, i32 -> vector<16x512xf32>
    %cst_12 = arith.constant 0.000000e+00 : f32
    %27 = vector.broadcast %cst_12 : f32 to vector<16x512xf32>
    %28 = arith.select %25, %26, %27 : vector<16x512xi1>, vector<16x512xf32>
    %c1 = arith.constant 1 : index
    %c0_13 = arith.constant 0 : index
    %29 = vector.load %arg2[%c1, %c0_13] : memref<13x512xf32, #tpu.memory_space<vmem>>, vector<1x512xf32>
    %30 = vector.broadcast %29 : vector<1x512xf32> to vector<16x512xf32>
    %31 = arith.mulf %28, %30 : vector<16x512xf32>
    %32 = arith.addf %23, %31 : vector<16x512xf32>
    %c1_i32_14 = arith.constant 1 : i32
    %33 = vector.broadcast %c1_i32_14 : i32 to vector<16x512xi32>
    %34 = arith.cmpi sge, %3, %33 : vector<16x512xi32>
    %c1_i32_15 = arith.constant 1 : i32
    %35 = tpu.dynamic_rotate %13 by %c1_i32_15 dim 0 : vector<16x512xf32>, i32 -> vector<16x512xf32>
    %cst_16 = arith.constant 0.000000e+00 : f32
    %36 = vector.broadcast %cst_16 : f32 to vector<16x512xf32>
    %37 = arith.select %34, %35, %36 : vector<16x512xi1>, vector<16x512xf32>
    %c2 = arith.constant 2 : index
    %c0_17 = arith.constant 0 : index
    %38 = vector.load %arg2[%c2, %c0_17] : memref<13x512xf32, #tpu.memory_space<vmem>>, vector<1x512xf32>
    %39 = vector.broadcast %38 : vector<1x512xf32> to vector<16x512xf32>
    %40 = arith.mulf %37, %39 : vector<16x512xf32>
    %41 = arith.addf %32, %40 : vector<16x512xf32>
    %c3 = arith.constant 3 : index
    %c0_18 = arith.constant 0 : index
    %42 = vector.load %arg2[%c3, %c0_18] : memref<13x512xf32, #tpu.memory_space<vmem>>, vector<1x512xf32>
    %43 = vector.broadcast %42 : vector<1x512xf32> to vector<16x512xf32>
    %44 = arith.mulf %8, %43 : vector<16x512xf32>
    %45 = arith.addf %41, %44 : vector<16x512xf32>
    %c4 = arith.constant 4 : index
    %c0_19 = arith.constant 0 : index
    %46 = vector.load %arg2[%c4, %c0_19] : memref<13x512xf32, #tpu.memory_space<vmem>>, vector<1x512xf32>
    %47 = vector.broadcast %46 : vector<1x512xf32> to vector<16x512xf32>
    %48 = arith.mulf %1, %47 : vector<16x512xf32>
    %49 = arith.addf %45, %48 : vector<16x512xf32>
    %c5 = arith.constant 5 : index
    %c0_20 = arith.constant 0 : index
    %50 = vector.load %arg2[%c5, %c0_20] : memref<13x512xf32, #tpu.memory_space<vmem>>, vector<1x512xf32>
    %51 = vector.broadcast %50 : vector<1x512xf32> to vector<16x512xf32>
    %52 = arith.mulf %13, %51 : vector<16x512xf32>
    %53 = arith.addf %49, %52 : vector<16x512xf32>
    %c15_i32 = arith.constant 15 : i32
    %54 = vector.broadcast %c15_i32 : i32 to vector<16x512xi32>
    %55 = arith.cmpi slt, %3, %54 : vector<16x512xi32>
    %c15_i32_21 = arith.constant 15 : i32
    %56 = tpu.dynamic_rotate %8 by %c15_i32_21 dim 0 : vector<16x512xf32>, i32 -> vector<16x512xf32>
    %cst_22 = arith.constant 0.000000e+00 : f32
    %57 = vector.broadcast %cst_22 : f32 to vector<16x512xf32>
    %58 = arith.select %55, %56, %57 : vector<16x512xi1>, vector<16x512xf32>
    %c6 = arith.constant 6 : index
    %c0_23 = arith.constant 0 : index
    %59 = vector.load %arg2[%c6, %c0_23] : memref<13x512xf32, #tpu.memory_space<vmem>>, vector<1x512xf32>
    %60 = vector.broadcast %59 : vector<1x512xf32> to vector<16x512xf32>
    %61 = arith.mulf %58, %60 : vector<16x512xf32>
    %62 = arith.addf %53, %61 : vector<16x512xf32>
    %c15_i32_24 = arith.constant 15 : i32
    %63 = vector.broadcast %c15_i32_24 : i32 to vector<16x512xi32>
    %64 = arith.cmpi slt, %3, %63 : vector<16x512xi32>
    %c15_i32_25 = arith.constant 15 : i32
    %65 = tpu.dynamic_rotate %1 by %c15_i32_25 dim 0 : vector<16x512xf32>, i32 -> vector<16x512xf32>
    %cst_26 = arith.constant 0.000000e+00 : f32
    %66 = vector.broadcast %cst_26 : f32 to vector<16x512xf32>
    %67 = arith.select %64, %65, %66 : vector<16x512xi1>, vector<16x512xf32>
    %c7 = arith.constant 7 : index
    %c0_27 = arith.constant 0 : index
    %68 = vector.load %arg2[%c7, %c0_27] : memref<13x512xf32, #tpu.memory_space<vmem>>, vector<1x512xf32>
    %69 = vector.broadcast %68 : vector<1x512xf32> to vector<16x512xf32>
    %70 = arith.mulf %67, %69 : vector<16x512xf32>
    %71 = arith.addf %62, %70 : vector<16x512xf32>
    %c15_i32_28 = arith.constant 15 : i32
    %72 = vector.broadcast %c15_i32_28 : i32 to vector<16x512xi32>
    %73 = arith.cmpi slt, %3, %72 : vector<16x512xi32>
    %c15_i32_29 = arith.constant 15 : i32
    %74 = tpu.dynamic_rotate %13 by %c15_i32_29 dim 0 : vector<16x512xf32>, i32 -> vector<16x512xf32>
    %cst_30 = arith.constant 0.000000e+00 : f32
    %75 = vector.broadcast %cst_30 : f32 to vector<16x512xf32>
    %76 = arith.select %73, %74, %75 : vector<16x512xi1>, vector<16x512xf32>
    %c8 = arith.constant 8 : index
    %c0_31 = arith.constant 0 : index
    %77 = vector.load %arg2[%c8, %c0_31] : memref<13x512xf32, #tpu.memory_space<vmem>>, vector<1x512xf32>
    %78 = vector.broadcast %77 : vector<1x512xf32> to vector<16x512xf32>
    %79 = arith.mulf %76, %78 : vector<16x512xf32>
    %80 = arith.addf %71, %79 : vector<16x512xf32>
    %c9 = arith.constant 9 : index
    %c0_32 = arith.constant 0 : index
    %81 = vector.load %arg2[%c9, %c0_32] : memref<13x512xf32, #tpu.memory_space<vmem>>, vector<1x512xf32>
    %82 = vector.broadcast %81 : vector<1x512xf32> to vector<16x512xf32>
    %83 = arith.addf %80, %82 : vector<16x512xf32>
    %cst_33 = arith.constant 5.000000e-01 : f32
    %84 = vector.broadcast %cst_33 : f32 to vector<16x512xf32>
    %85 = arith.mulf %84, %83 : vector<16x512xf32>
    %cst_34 = arith.constant 4.471500e-02 : f32
    %86 = vector.broadcast %cst_34 : f32 to vector<16x512xf32>
    %87 = arith.mulf %86, %83 : vector<16x512xf32>
    %88 = arith.mulf %87, %83 : vector<16x512xf32>
    %89 = arith.mulf %88, %83 : vector<16x512xf32>
    %90 = arith.addf %83, %89 : vector<16x512xf32>
    %cst_35 = arith.constant 0.797884583 : f32
    %91 = vector.broadcast %cst_35 : f32 to vector<16x512xf32>
    %92 = arith.mulf %91, %90 : vector<16x512xf32>
    %93 = math.tanh %92 : vector<16x512xf32>
    %cst_36 = arith.constant 1.000000e+00 : f32
    %94 = vector.broadcast %cst_36 : f32 to vector<16x512xf32>
    %95 = arith.addf %94, %93 : vector<16x512xf32>
    %96 = arith.mulf %85, %95 : vector<16x512xf32>
    %c10 = arith.constant 10 : index
    %c0_37 = arith.constant 0 : index
    %97 = vector.load %arg2[%c10, %c0_37] : memref<13x512xf32, #tpu.memory_space<vmem>>, vector<1x512xf32>
    %98 = vector.broadcast %97 : vector<1x512xf32> to vector<16x512xf32>
    %99 = arith.mulf %96, %98 : vector<16x512xf32>
    %c11 = arith.constant 11 : index
    %c0_38 = arith.constant 0 : index
    %100 = vector.load %arg2[%c11, %c0_38] : memref<13x512xf32, #tpu.memory_space<vmem>>, vector<1x512xf32>
    %101 = vector.broadcast %100 : vector<1x512xf32> to vector<16x512xf32>
    %102 = arith.addf %99, %101 : vector<16x512xf32>
    %103 = arith.addf %102, %1 : vector<16x512xf32>
    %c0_39 = arith.constant 0 : index
    %c0_40 = arith.constant 0 : index
    %104 = vector.load %arg3[%c0_39, %c0_40] : memref<512x512xf32, #tpu.memory_space<vmem>>, vector<512x512xf32>
    %cst_41 = arith.constant dense<0.000000e+00> : vector<16x512xf32>
    %105 = tpu.matmul %103, %104, %cst_41 {dimension_numbers = #tpu.dot_dimension_numbers<[1], [0], [0], [1], [0, 0, 1, 1], [], []>} : vector<16x512xf32>, vector<512x512xf32>, vector<16x512xf32> -> vector<16x512xf32>
    %c12 = arith.constant 12 : index
    %c0_42 = arith.constant 0 : index
    %106 = vector.load %arg2[%c12, %c0_42] : memref<13x512xf32, #tpu.memory_space<vmem>>, vector<1x512xf32>
    %107 = vector.broadcast %106 : vector<1x512xf32> to vector<16x512xf32>
    %108 = arith.addf %105, %107 : vector<16x512xf32>
    %cst_43 = arith.constant 5.000000e-01 : f32
    %109 = vector.broadcast %cst_43 : f32 to vector<16x512xf32>
    %110 = arith.mulf %109, %108 : vector<16x512xf32>
    %cst_44 = arith.constant 4.471500e-02 : f32
    %111 = vector.broadcast %cst_44 : f32 to vector<16x512xf32>
    %112 = arith.mulf %111, %108 : vector<16x512xf32>
    %113 = arith.mulf %112, %108 : vector<16x512xf32>
    %114 = arith.mulf %113, %108 : vector<16x512xf32>
    %115 = arith.addf %108, %114 : vector<16x512xf32>
    %cst_45 = arith.constant 0.797884583 : f32
    %116 = vector.broadcast %cst_45 : f32 to vector<16x512xf32>
    %117 = arith.mulf %116, %115 : vector<16x512xf32>
    %118 = math.tanh %117 : vector<16x512xf32>
    %cst_46 = arith.constant 1.000000e+00 : f32
    %119 = vector.broadcast %cst_46 : f32 to vector<16x512xf32>
    %120 = arith.addf %119, %118 : vector<16x512xf32>
    %121 = arith.mulf %110, %120 : vector<16x512xf32>
    %cst_47 = arith.constant dense<0.000000e+00> : vector<512xf32>
    %122 = vector.multi_reduction <add>, %121, %cst_47 [0] : vector<16x512xf32> to vector<512xf32>
    %123 = vector.shape_cast %122 : vector<512xf32> to vector<1x512xf32>
    %c0_48 = arith.constant 0 : index
    %c0_49 = arith.constant 0 : index
    %124 = vector.load %arg4[%c0_48, %c0_49] : memref<512x2xf32, #tpu.memory_space<vmem>>, vector<512x2xf32>
    %cst_50 = arith.constant dense<0.000000e+00> : vector<1x2xf32>
    %125 = tpu.matmul %123, %124, %cst_50 {dimension_numbers = #tpu.dot_dimension_numbers<[1], [0], [0], [1], [0, 0, 1, 1], [], []>} : vector<1x512xf32>, vector<512x2xf32>, vector<1x2xf32> -> vector<1x2xf32>
    %c0_51 = arith.constant 0 : index
    %c0_52 = arith.constant 0 : index
    %126 = vector.load %arg5[%c0_51, %c0_52] : memref<1x2xf32, #tpu.memory_space<vmem>>, vector<1x2xf32>
    %127 = arith.addf %125, %126 : vector<1x2xf32>
    %cst_53 = arith.constant 0.000000e+00 : f32
    %128 = vector.broadcast %cst_53 : f32 to vector<1x2xf32>
    %129 = arith.maximumf %127, %128 : vector<1x2xf32>
    %c0_54 = arith.constant 0 : index
    %c0_55 = arith.constant 0 : index
    %130 = vector.load %arg6[%c0_54, %c0_55] : memref<2x512xf32, #tpu.memory_space<vmem>>, vector<2x512xf32>
    %cst_56 = arith.constant dense<0.000000e+00> : vector<1x512xf32>
    %131 = tpu.matmul %129, %130, %cst_56 {dimension_numbers = #tpu.dot_dimension_numbers<[1], [0], [0], [1], [0, 0, 1, 1], [], []>} : vector<1x2xf32>, vector<2x512xf32>, vector<1x512xf32> -> vector<1x512xf32>
    %132 = arith.negf %131 : vector<1x512xf32>
    %133 = math.exp %132 : vector<1x512xf32>
    %cst_57 = arith.constant 1.000000e+00 : f32
    %134 = vector.broadcast %cst_57 : f32 to vector<1x512xf32>
    %135 = arith.addf %134, %133 : vector<1x512xf32>
    %136 = arith.divf %134, %135 : vector<1x512xf32>
    %137 = math.exp %136 : vector<1x512xf32>
    %138 = vector.broadcast %137 : vector<1x512xf32> to vector<16x512xf32>
    %139 = arith.mulf %1, %138 : vector<16x512xf32>
    %c0_58 = arith.constant 0 : index
    %c0_59 = arith.constant 0 : index
    %c0_60 = arith.constant 0 : index
    %140 = vector.load %arg7[%c0_58, %c0_59, %c0_60] : memref<1x16x512xf32, #tpu.memory_space<vmem>>, vector<1x16x512xf32>
    %141 = vector.shape_cast %140 : vector<1x16x512xf32> to vector<16x512xf32>
    %142 = vector.shape_cast %139 : vector<16x512xf32> to vector<1x16x512xf32>
    tpu.vector_store %arg7[%c0_58, %c0_59, %c0_60], %142 {strides = array<i32>} : memref<1x16x512xf32, #tpu.memory_space<vmem>>, vector<1x16x512xf32>,
    return
  }
  func.func @transform_0(%arg0: i32) -> (i32, i32, i32) {
    %c0_i32 = arith.constant 0 : i32
    %c0_i32_0 = arith.constant 0 : i32
    %c0_i32_1 = arith.constant 0 : i32
    return %arg0, %c0_i32, %c0_i32_0 : i32, i32, i32
  }
  func.func @transform_1(%arg0: i32) -> (i32, i32) {
    %c0_i32 = arith.constant 0 : i32
    %c0_i32_0 = arith.constant 0 : i32
    %c0_i32_1 = arith.constant 0 : i32
    return %c0_i32, %c0_i32_0 : i32, i32
  }
  func.func @transform_2(%arg0: i32) -> (i32, i32) {
    %c0_i32 = arith.constant 0 : i32
    %c0_i32_0 = arith.constant 0 : i32
    %c0_i32_1 = arith.constant 0 : i32
    return %c0_i32, %c0_i32_0 : i32, i32
  }
  func.func @transform_3(%arg0: i32) -> (i32, i32) {
    %c0_i32 = arith.constant 0 : i32
    %c0_i32_0 = arith.constant 0 : i32
    %c0_i32_1 = arith.constant 0 : i32
    return %c0_i32, %c0_i32_0 : i32, i32
  }
  func.func @transform_4(%arg0: i32) -> (i32, i32) {
    %c0_i32 = arith.constant 0 : i32
    %c0_i32_0 = arith.constant 0 : i32
    %c0_i32_1 = arith.constant 0 : i32
    return %c0_i32, %c0_i32_0 : i32, i32
  }
  func.func @transform_5(%arg0: i32) -> (i32, i32) {
    %c0_i32 = arith.constant 0 : i32
    %c0_i32_0 = arith.constant 0 : i32
    %c0_i32_1 = arith.constant 0 : i32
    return %c0_i32, %c0_i32_0 : i32, i32
  }
  func.func @transform_6(%arg0: i32) -> (i32, i32, i32) {
    %c0_i32 = arith.constant 0 : i32
    %c0_i32_0 = arith.constant 0 : i32
    %c0_i32_1 = arith.constant 0 : i32
    return %arg0, %c0_i32, %c0_i32_0 : i32, i32, i32
  }
}

</mosaic_0001>

<bundles_post_ra>
// kernel: tpu_custom_call.1
= control target key start
LH: loop header
LB: loop body
LE: loop exit
PB: predicated region body
PF: predicated region fallthrough
CT: control target
= control target key end

     0   :  { %11 = vsyncpa [#allocation3], 0  ;;  %s3718_s0 = inlined_call_operand.vmem [shape: f32[2,16,512], index: 0, kind: input, shape index: {}]   ;;  %s3719_s1 = inlined_call_operand.vmem [shape: f32[13,512], index: 1, kind: input, shape index: {}]   ;;  %s3720_s2 = inlined_call_operand.hbm [shape: f32[512,512], index: 2, kind: input, shape index: {}]   ;;  %s3721_s3 = inlined_call_operand.vmem [shape: f32[512,2], index: 3, kind: input, shape index: {}]   ;;  %s3722_s4 = inlined_call_operand.vmem [shape: f32[1,2], index: 4, kind: input, shape index: {}]   ;;  %s3723_s5 = inlined_call_operand.vmem [shape: f32[2,512], index: 5, kind: input, shape index: {}]   ;;  %s3724_s6 = inlined_call_operand.hbm [shape: f32[2,16,512], index: 6, kind: output, shape index: {}]  }
   0x1   :  { %12 = vsyncpa [#allocation4], 0 }
   0x2   :  { %14 = vsyncpa [#allocation4 + $0x1], 0  ;;  %s2621_s21 = smov 0   ;;  %s2623_s22 = smov 0  }
   0x3   :  { %s2625_s23 = smov 0   ;;  %s2627_s24 = smov 0  }
   0x4 LB: > { %s2642_s25 = sadd.s32 4294967295, %s2575_s24   ;;  %s2247_s26 = sadd.s32 4294967294, %s2575_s24   ;;  %s2575_s24 = sphi %s2627_s24, %s3804_s24   ;;  %s2571_s23 = sphi %s2625_s23, %s3803_s23   ;;  %s2567_s22 = sphi %s2623_s22, %s3802_s22   ;;  %s2563_s21 = sphi %s2621_s21, %s3801_s21  }
   0x5   : > { %s2646_s27 = sadd.s32 1, %s2575_s24   ;;  %s158_s28 = sadd.s32 1, %s2571_s23 }
   0x6   : > { %s155_s29 = ssub.s32 %s2575_s24, %s2646_s27  ;;  %p168_p0 = scmp.ne.s32.totalorder %s2571_s23, %s2567_s22 }
   0x7   : > { %p156_p1 = scmp.eq.s32.totalorder %s155_s29, 0  ;;  %p169_p2 = scmp.eq.s32.totalorder %s2642_s25, 1 }
   0x8   : > { %p174_p3 = scmp.ne.s32.totalorder %s2567_s22, %s2563_s21  ;;  %p175_p4 = scmp.eq.s32.totalorder %s2247_s26, 1 }
   0x9   : > { %s2657_s30 = scalar_select %p156_p1, %s2571_s23, %s158_s28  }
   0xa   : > { %p2659_p5 = por %p169_p2, %p168_p0  ;;  %p2663_p6 = por %p175_p4, %p174_p3 }
   0xb   : > { %p2248_p7 = scmp.ge.s32.totalorder %s2575_s24, 1  ;;  %p182_p8 = scmp.lt.s32.totalorder %s2575_s24, 3 }
   0xc   : > { %s3744_s8 = scalar_select %p2663_p6, 1, 0 }
   0xd   : > { %p2369_p9 = scmp.eq.s32.totalorder %s2642_s25, 0  ;;  %p2670_p10 = pnand %p2248_p7, %p182_p8 }
   0xe   : > { %s2577_s10 = smov [#allocation2]  }
   0xf   : > { %s197_s11 = sshll.u32 %s2577_s10, 4  ;;  %p2361_p11 = pneg %p2670_p10  ;;  %s198_s11 = int_to_ptr.vmem [resolvable:$true] %s197_s11 }
  0x10   : > { %s2496_s12 = scalar_lea.vmem %s198_s11, 32768  ;;  %p2504_p3 = scmp.lt.s32.totalorder %s198_s11, %s198_s11 }
  0x11   : > { %p2362_p12 = pnand %p2369_p9, %p2361_p11  ;;  %p2497_p0 = scmp.ne.s32.totalorder %s198_s11, %s2496_s12 }
  0x12   : > { %p2505_p4 = scmp.lt.s32.totalorder %s2496_s12, %s2496_s12 }
  0x13   : > { %p2487_p13 = pneg %p2362_p12 }
  0x14   : > { %p2506_p6 = por %p2505_p4, %p2504_p3 }
  0x15   : > { %p2499_p1 = pnand %p2497_p0, %p2487_p13 }
  0x17   : > { %p2500_p2 = pneg %p2499_p1 }
  0x19   : > { %p2507_p7 = pnand %p2506_p6, %p2500_p2 }
  0x1b   : > { %2510 = shalt.err (!%p2507_p7)
}
  0x1c   : > { %s2578_s13 = smov 512   ;;  %s2579_s14 = smov 32  }
  0x1d   : > { %2364 = dma.hbm_to_vmem [thread:$0]  (!%p2362_p12), %s3720_s2, 32768, %s198_s11, [#allocation3], %s2578_s13, %s2578_s13, %s2579_s14  }
  0x1e   : > { %230 = sbr.rel (%p2670_p10) target bundleno = 1030 (0x406), region = 44 }
  0x23   : > { %2554 = dma.done.wait (%p2369_p9), [#allocation3], 32768  }
  0x24   : > { %2556 = vsyncadd (%p2369_p9), [#allocation3], 4294934528  ;;  %p260_p8 = scmp.lt.s32.totalorder %s2642_s25, 1  ;;  %s2580_s28 = smov 32   ;;  %v1089_v8 = vld [vmem:[#allocation2 + $0x1e8] sm:$0xff]  ;;  %v1088_v9 = vld [vmem:[#allocation2 + $0x1e0] sm:$0xff] }
  0x25   : > { %v1085_v10 = vld [vmem:[#allocation2 + $0x1c8] sm:$0xff]  ;;  %1307 = vmatprep.subr.mxu0 %v1089_v8  ;;  %v1084_v11 = vld [vmem:[#allocation2 + $0x1c0] sm:$0xff]  ;;  %s2581_s29 = smov 96   ;;  %vm1944_vm8 = vcmask 1041408   ;;  %vm1940_vm9 = vcmask 15360   ;;  %s257_s11 = sand.u32 1, %s2567_s22  }
  0x26   : > { %s261_s17 = scalar_select %p260_p8, %s2642_s25, 1  ;;  %1308 = vmatpush1.msra.mxu0 %v1088_v9  ;;  %v1081_v12 = vld [vmem:[#allocation2 + $0x1a8] sm:$0xff]  ;;  %v1080_v13 = vld [vmem:[#allocation2 + $0x1a0] sm:$0xff] }
  0x27   : > { %1309 = vmatprep.subr.mxu0 %v1085_v10  ;;  %v1217_v14 = vld [vmem:[#allocation2 + $0x5e8] sm:$0xff]  ;;  %v1216_v16 = vld [vmem:[#allocation2 + $0x5e0] sm:$0xff]  ;;  %s2253_s12 = sshll.u32 %s257_s11, 6  ;;  %s2284_s13 = sshll.u32 %s2642_s25, 10 }
  0x28   : > { %s2283_s18 = sshll.u32 %s261_s17, 6  ;;  %1310 = vmatpush1.msra.mxu0 %v1084_v11  ;;  %v1077_v15 = vld [vmem:[#allocation2 + $0x188] sm:$0xff]  ;;  %1384 = vmatprep.subr.mxu1 %v1217_v14  ;;  %v1076_v17 = vld [vmem:[#allocation2 + $0x180] sm:$0xff]  ;;  %s259_s14 = scalar_lea.vmem [#allocation5], %s2253_s12 }
  0x29   : > { %s2692_s26 = scalar_lea.vmem %s3718_s0, %s2283_s18  ;;  %1311 = vmatprep.subr.mxu0 %v1081_v12  ;;  %1385 = vmatpush1.msra.mxu1 %v1216_v16  ;;  %v1213_v18 = vld [vmem:[#allocation2 + $0x5c8] sm:$0xff]  ;;  %v1212_v20 = vld [vmem:[#allocation2 + $0x5c0] sm:$0xff]  ;;  %s2173_s15 = sshll.u32 %s259_s14, 4  ;;  %s3673_s15 = int_to_ptr.vmem [resolvable:$true] %s2173_s15 }
  0x2a   : > { %v2695_v0 = vld [vmem:[%s2692_s26 + $0x8] sm:$0xff]  ;;  %v2698_v1 = vld [vmem:[%s2692_s26] sm:$0xff]  ;;  %v2715_v4 = vld [vmem:[%s2692_s26 + $0x38] sm:$0xff]  ;;  %1312 = vmatpush1.msra.mxu0 %v1080_v13  ;;  %1386 = vmatprep.subr.mxu1 %v1213_v18  ;;  %s3669_s17 = scalar_lea.hbm %s3724_s6, %s2284_s13  ;;  %s3677_s18 = scalar_lea.sflag [#allocation4], %s257_s11 }
  0x2b   : > { %289 = vrot.lane.b32.xlu1 %v2695_v0, %s2580_s28  ;;  %285 = vrot.lane.b32.xlu0 %v2698_v1, %s2580_s28  ;;  %v2705_v2 = vld [vmem:[%s2692_s26 + $0x28] sm:$0xff]  ;;  %v2708_v3 = vld [vmem:[%s2692_s26 + $0x20] sm:$0xff]  ;;  %s2511_s19 = scalar_lea.vmem %s3673_s15, 1024  ;;  %s2584_s20 = smov [#allocation5]  }
  0x2c   : > { %v2718_v5 = vld [vmem:[%s2692_s26 + $0x18] sm:$0xff]  ;;  %v2725_v6 = vld [vmem:[%s2692_s26 + $0x30] sm:$0xff]  ;;  %v1073_v19 = vld [vmem:[#allocation2 + $0x168] sm:$0xff]  ;;  %1313 = vmatprep.subr.mxu0 %v1077_v15  ;;  %1387 = vmatpush1.msra.mxu1 %v1212_v20  ;;  %p2512_p6 = scmp.ne.s32.totalorder %s3673_s15, %s2511_s19 }
  0x2d   : > { %v2728_v7 = vld [vmem:[%s2692_s26 + $0x10] sm:$0xff]  ;;  %v1209_v21 = vld [vmem:[#allocation2 + $0x5a8] sm:$0xff]  ;;  %1314 = vmatpush1.msra.mxu0 %v1076_v17  ;;  %v1072_v22 = vld [vmem:[#allocation2 + $0x160] sm:$0xff] }
  0x2e   : > { %v1208_v23 = vld [vmem:[#allocation2 + $0x5a0] sm:$0xff]  ;;  %1315 = vmatprep.subr.mxu0 %v1073_v19  ;;  %v1069_v24 = vld [vmem:[#allocation2 + $0x148] sm:$0xff]  ;;  %1388 = vmatprep.subr.mxu1 %v1209_v21  ;;  %p2513_p9 = pnand %p2512_p6, %p2659_p5 }
  0x2f   : > { %291 = vrot.lane.b32.xlu1 %v2705_v2, %s2580_s28  ;;  %287 = vrot.lane.b32.xlu0 %v2708_v3, %s2580_s28  ;;  %v1068_v25 = vld [vmem:[#allocation2 + $0x140] sm:$0xff]  ;;  %v1065_v26 = vld [vmem:[#allocation2 + $0x128] sm:$0xff] }
  0x30   : > { %1316 = vmatpush1.msra.mxu0 %v1072_v22  ;;  %1389 = vmatpush1.msra.mxu1 %v1208_v23  ;;  %v1205_v27 = vld [vmem:[#allocation2 + $0x588] sm:$0xff]  ;;  %v1064_v28 = vld [vmem:[#allocation2 + $0x120] sm:$0xff]  ;;  %p2514_p10 = pneg %p2513_p9 }
  0x31   : > { %1317 = vmatprep.subr.mxu0 %v1069_v24  ;;  %1390 = vmatprep.subr.mxu1 %v1205_v27  ;;  %v1204_v29 = vld [vmem:[#allocation2 + $0x580] sm:$0xff]  ;;  %v1061_v30 = vld [vmem:[#allocation2 + $0x108] sm:$0xff] }
  0x32   : > { %1318 = vmatpush1.msra.mxu0 %v1068_v25  ;;  %v1201_v31 = vld [vmem:[#allocation2 + $0x568] sm:$0xff]  ;;  %1391 = vmatpush1.msra.mxu1 %v1204_v29  ;;  %v1060_v32 = vld [vmem:[#allocation2 + $0x100] sm:$0xff] }
  0x33   : > { %299 = vrot.lane.b32.xlu1 %v2715_v4, %s2580_s28  ;;  %297 = vrot.lane.b32.xlu0 %v2718_v5, %s2580_s28  ;;  %v1200_v33 = vld [vmem:[#allocation2 + $0x560] sm:$0xff]  ;;  %v1057_v34 = vld [vmem:[#allocation2 + $0xe8] sm:$0xff] }
  0x34   : > { %1319 = vmatprep.subr.mxu0 %v1065_v26  ;;  %1392 = vmatprep.subr.mxu1 %v1201_v31  ;;  %v1197_v35 = vld [vmem:[#allocation2 + $0x548] sm:$0xff]  ;;  %v1056_v36 = vld [vmem:[#allocation2 + $0xe0] sm:$0xff] }
  0x35   : > { %1320 = vmatpush1.msra.mxu0 %v1064_v28  ;;  %1393 = vmatpush1.msra.mxu1 %v1200_v33  ;;  %v1196_v37 = vld [vmem:[#allocation2 + $0x540] sm:$0xff]  ;;  %v1053_v38 = vld [vmem:[#allocation2 + $0xc8] sm:$0xff] }
  0x36   : > { %1321 = vmatprep.subr.mxu0 %v1061_v30  ;;  %1394 = vmatprep.subr.mxu1 %v1197_v35  ;;  %v1193_v39 = vld [vmem:[#allocation2 + $0x528] sm:$0xff]  ;;  %v1052_v40 = vld [vmem:[#allocation2 + $0xc0] sm:$0xff] }
  0x37   : > { %295 = vrot.lane.b32.xlu1 %v2725_v6, %s2580_s28  ;;  %293 = vrot.lane.b32.xlu0 %v2728_v7, %s2580_s28  ;;  %v1192_v41 = vld [vmem:[#allocation2 + $0x520] sm:$0xff]  ;;  %v1049_v42 = vld [vmem:[#allocation2 + $0xa8] sm:$0xff] }
  0x38   : > { %1322 = vmatpush1.msra.mxu0 %v1060_v32  ;;  %1395 = vmatpush1.msra.mxu1 %v1196_v37  ;;  %v1189_v43 = vld [vmem:[#allocation2 + $0x508] sm:$0xff]  ;;  %v1048_v44 = vld [vmem:[#allocation2 + $0xa0] sm:$0xff] }
  0x39   : > { %1323 = vmatprep.subr.mxu0 %v1057_v34  ;;  %1396 = vmatprep.subr.mxu1 %v1193_v39  ;;  %v1188_v45 = vld [vmem:[#allocation2 + $0x500] sm:$0xff]  ;;  %v1045_v46 = vld [vmem:[#allocation2 + $0x88] sm:$0xff] }
  0x3a   : > { %1324 = vmatpush1.msra.mxu0 %v1056_v36  ;;  %1397 = vmatpush1.msra.mxu1 %v1192_v41  ;;  %v1185_v47 = vld [vmem:[#allocation2 + $0x4e8] sm:$0xff]  ;;  %v1044_v48 = vld [vmem:[#allocation2 + $0x80] sm:$0xff] }
  0x3b   : > { %328 = vrot.lane.b32.xlu1 %v2705_v2, %s2581_s29  ;;  %326 = vrot.lane.b32.xlu0 %v2695_v0, %s2581_s29  ;;  %v1184_v49 = vld [vmem:[#allocation2 + $0x4e0] sm:$0xff]  ;;  %v1041_v50 = vld [vmem:[#allocation2 + $0x68] sm:$0xff] }
  0x3c   : > { %1325 = vmatprep.subr.mxu0 %v1053_v38  ;;  %1398 = vmatprep.subr.mxu1 %v1189_v43  ;;  %v1181_v51 = vld [vmem:[#allocation2 + $0x4c8] sm:$0xff]  ;;  %v1040_v52 = vld [vmem:[#allocation2 + $0x60] sm:$0xff] }
  0x3d   : > { %1326 = vmatpush1.msra.mxu0 %v1052_v40  ;;  %1399 = vmatpush1.msra.mxu1 %v1188_v45  ;;  %v1180_v53 = vld [vmem:[#allocation2 + $0x4c0] sm:$0xff]  ;;  %v1037_v54 = vld [vmem:[#allocation2 + $0x48] sm:$0xff] }
  0x3e   : > { %1327 = vmatprep.subr.mxu0 %v1049_v42  ;;  %1400 = vmatprep.subr.mxu1 %v1185_v47  ;;  %v1177_v55 = vld [vmem:[#allocation2 + $0x4a8] sm:$0xff]  ;;  %v1036_v56 = vld [vmem:[#allocation2 + $0x40] sm:$0xff] }
  0x3f   : > { %332 = vrot.lane.b32.xlu1 %v2725_v6, %s2581_s29  ;;  %330 = vrot.lane.b32.xlu0 %v2728_v7, %s2581_s29  ;;  %v1176_v57 = vld [vmem:[#allocation2 + $0x4a0] sm:$0xff]  ;;  %v1033_v58 = vld [vmem:[#allocation2 + $0x28] sm:$0xff] }
  0x40   : > { %1328 = vmatpush1.msra.mxu0 %v1048_v44  ;;  %1401 = vmatpush1.msra.mxu1 %v1184_v49  ;;  %v1173_v59 = vld [vmem:[#allocation2 + $0x488] sm:$0xff]  ;;  %v1032_v60 = vld [vmem:[#allocation2 + $0x20] sm:$0xff] }
  0x41   : > { %1329 = vmatprep.subr.mxu0 %v1045_v46  ;;  %1402 = vmatprep.subr.mxu1 %v1181_v51  ;;  %v1172_v61 = vld [vmem:[#allocation2 + $0x480] sm:$0xff]  ;;  %v1029_v62 = vld [vmem:[#allocation2 + $0x8] sm:$0xff] }
  0x42   : > { %1330 = vmatpush1.msra.mxu0 %v1044_v48  ;;  %1403 = vmatpush1.msra.mxu1 %v1180_v53  ;;  %v1169_v63 = vld [vmem:[#allocation2 + $0x468] sm:$0xff]  ;;  %v1028_v8 = vld [vmem:[#allocation2] sm:$0xff] }
  0x43   : > { %324 = vrot.lane.b32.xlu1 %v2708_v3, %s2581_s29  ;;  %322 = vrot.lane.b32.xlu0 %v2698_v1, %s2581_s29  ;;  %v1168_v9 = vld [vmem:[#allocation2 + $0x460] sm:$0xff]  ;;  %v1153_v10 = vld [vmem:[#allocation2 + $0x3e8] sm:$0xff] }
  0x44   : > { %1331 = vmatprep.subr.mxu0 %v1041_v50  ;;  %1404 = vmatprep.subr.mxu1 %v1177_v55  ;;  %v1165_v11 = vld [vmem:[#allocation2 + $0x448] sm:$0xff]  ;;  %v1152_v12 = vld [vmem:[#allocation2 + $0x3e0] sm:$0xff] }
  0x45   : > { %1332 = vmatpush1.msra.mxu0 %v1040_v52  ;;  %1405 = vmatpush1.msra.mxu1 %v1176_v57  ;;  %v1164_v13 = vld [vmem:[#allocation2 + $0x440] sm:$0xff]  ;;  %v1149_v14 = vld [vmem:[#allocation2 + $0x3c8] sm:$0xff] }
  0x46   : > { %1333 = vmatprep.subr.mxu0 %v1037_v54  ;;  %1406 = vmatprep.subr.mxu1 %v1173_v59  ;;  %v1161_v15 = vld [vmem:[#allocation2 + $0x428] sm:$0xff]  ;;  %v1148_v16 = vld [vmem:[#allocation2 + $0x3c0] sm:$0xff] }
  0x47   : > { %336 = vrot.lane.b32.xlu1 %v2715_v4, %s2581_s29  ;;  %334 = vrot.lane.b32.xlu0 %v2718_v5, %s2581_s29  ;;  %v1160_v17 = vld [vmem:[#allocation2 + $0x420] sm:$0xff]  ;;  %v1145_v18 = vld [vmem:[#allocation2 + $0x3a8] sm:$0xff] }
  0x48   : > { %1334 = vmatpush1.msra.mxu0 %v1036_v56  ;;  %1407 = vmatpush1.msra.mxu1 %v1172_v61  ;;  %v1157_v19 = vld [vmem:[#allocation2 + $0x408] sm:$0xff]  ;;  %v1144_v20 = vld [vmem:[#allocation2 + $0x3a0] sm:$0xff] }
  0x49   : > { %1335 = vmatprep.subr.mxu0 %v1033_v58  ;;  %1408 = vmatprep.subr.mxu1 %v1169_v63  ;;  %v1156_v21 = vld [vmem:[#allocation2 + $0x400] sm:$0xff]  ;;  %v1141_v22 = vld [vmem:[#allocation2 + $0x388] sm:$0xff] }
  0x4a   : > { %1336 = vmatpush1.msra.mxu0 %v1032_v60  ;;  %1409 = vmatpush1.msra.mxu1 %v1168_v9  ;;  %v1281_v23 = vld [vmem:[#allocation2 + $0x7e8] sm:$0xff]  ;;  %v1140_v24 = vld [vmem:[#allocation2 + $0x380] sm:$0xff] }
  0x4b   : > { %1337 = vmatprep.subr.mxu0 %v1029_v62  ;;  %1410 = vmatprep.subr.mxu1 %v1165_v11  ;;  %v1280_v25 = vld [vmem:[#allocation2 + $0x7e0] sm:$0xff]  ;;  %v1137_v26 = vld [vmem:[#allocation2 + $0x368] sm:$0xff] }
  0x4c   : > { %1338 = vmatpush1.msra.mxu0 %v1028_v8  ;;  %1411 = vmatpush1.msra.mxu1 %v1164_v13  ;;  %v1277_v27 = vld [vmem:[#allocation2 + $0x7c8] sm:$0xff]  ;;  %v1136_v28 = vld [vmem:[#allocation2 + $0x360] sm:$0xff] }
  0x4d   : > { %1339 = vmatprep.subr.mxu0 %v1153_v10  ;;  %1412 = vmatprep.subr.mxu1 %v1161_v15  ;;  %v1276_v29 = vld [vmem:[#allocation2 + $0x7c0] sm:$0xff]  ;;  %v1133_v30 = vld [vmem:[#allocation2 + $0x348] sm:$0xff] }
  0x4e   : > { %1340 = vmatpush2.msra.mxu0 %v1152_v12  ;;  %1413 = vmatpush1.msra.mxu1 %v1160_v17  ;;  %v1273_v31 = vld [vmem:[#allocation2 + $0x7a8] sm:$0xff]  ;;  %v1132_v32 = vld [vmem:[#allocation2 + $0x340] sm:$0xff]  ;;  %v273_v17 = vlaneseq }
  0x4f   : > { %1341 = vmatprep.subr.mxu0 %v1149_v14  ;;  %1414 = vmatprep.subr.mxu1 %v1157_v19  ;;  %v1272_v33 = vld [vmem:[#allocation2 + $0x7a0] sm:$0xff]  ;;  %v1129_v34 = vld [vmem:[#allocation2 + $0x328] sm:$0xff]  ;;  %v1091_v19 = vld [vmem:[#allocation2 + $0x1f8] sm:$0xff] }
  0x50   : > { %1342 = vmatpush2.msra.mxu0 %v1148_v16  ;;  %1415 = vmatpush1.msra.mxu1 %v1156_v21  ;;  %v1269_v35 = vld [vmem:[#allocation2 + $0x788] sm:$0xff]  ;;  %v1128_v36 = vld [vmem:[#allocation2 + $0x320] sm:$0xff] }
  0x51   : > { %1343 = vmatprep.subr.mxu0 %v1145_v18  ;;  %1416 = vmatprep.subr.mxu1 %v1281_v23  ;;  %v1268_v37 = vld [vmem:[#allocation2 + $0x780] sm:$0xff]  ;;  %v1125_v38 = vld [vmem:[#allocation2 + $0x308] sm:$0xff]  ;;  %v2750_v23 = vshrl.u32 %v273_v17, 7 }
  0x52   : > { %1344 = vmatpush2.msra.mxu0 %v1144_v20  ;;  %1417 = vmatpush2.msra.mxu1 %v1280_v25  ;;  %v1265_v39 = vld [vmem:[#allocation2 + $0x768] sm:$0xff]  ;;  %v1124_v40 = vld [vmem:[#allocation2 + $0x300] sm:$0xff]  ;;  %v421_v25 = vrot.slane %v2695_v0, 7 }
  0x53   : > { %1345 = vmatprep.subr.mxu0 %v1141_v22  ;;  %1418 = vmatprep.subr.mxu1 %v1277_v27  ;;  %v1264_v41 = vld [vmem:[#allocation2 + $0x760] sm:$0xff]  ;;  %v1121_v42 = vld [vmem:[#allocation2 + $0x2e8] sm:$0xff]  ;;  %vm365_vm0 = vcmp.lt.s32.totalorder %v2750_v23, 1  ;;  %vm673_vm1 = vcmp.lt.s32.totalorder %v2750_v23, 7  ;;  %vm355_vm2 = vcmp.ge.s32.totalorder %v2750_v23, 1 }
  0x54   : > { %1346 = vmatpush2.msra.mxu0 %v1140_v24  ;;  %1419 = vmatpush2.msra.mxu1 %v1276_v29  ;;  %v1261_v43 = vld [vmem:[#allocation2 + $0x748] sm:$0xff]  ;;  %v1120_v44 = vld [vmem:[#allocation2 + $0x2e0] sm:$0xff]  ;;  %v420_v29 = vrot.slane %v2698_v1, 7 }
  0x55   : > { %1347 = vmatprep.subr.mxu0 %v1137_v26  ;;  %1420 = vmatprep.subr.mxu1 %v1273_v31  ;;  %v1260_v45 = vld [vmem:[#allocation2 + $0x740] sm:$0xff]  ;;  %v1117_v46 = vld [vmem:[#allocation2 + $0x2c8] sm:$0xff]  ;;  %v425_v26 = vrot.slane %v2705_v2, 7  ;;  %v2757_v31 = vand.u32 127, %v273_v17 }
  0x56   : > { %1348 = vmatpush2.msra.mxu0 %v1136_v28  ;;  %1421 = vmatpush2.msra.mxu1 %v1272_v33  ;;  %v1257_v47 = vld [vmem:[#allocation2 + $0x728] sm:$0xff]  ;;  %v1116_v48 = vld [vmem:[#allocation2 + $0x2c0] sm:$0xff]  ;;  %v424_v28 = vrot.slane %v2708_v3, 7  ;;  %v1219_v33 = vld [vmem:[#allocation2 + $0x5f8] sm:$0xff] }
  0x57   : > { %1349 = vmatprep.subr.mxu0 %v1133_v30  ;;  %1422 = vmatprep.subr.mxu1 %v1269_v35  ;;  %v1256_v49 = vld [vmem:[#allocation2 + $0x720] sm:$0xff]  ;;  %v1113_v50 = vld [vmem:[#allocation2 + $0x2a8] sm:$0xff]  ;;  %v2766_v35 = vsub.s32 1, %v2750_v23  ;;  %vm301_vm4 = vcmp.lt.s32.totalorder %v2757_v31, 32  ;;  %vm281_vm5 = vcmp.ge.s32.totalorder %v2757_v31, 32  ;;  %vm338_vm6 = vcmp.lt.s32.totalorder %v2757_v31, 96 }
  0x58   : > { %1350 = vmatpush2.msra.mxu0 %v1132_v32  ;;  %1423 = vmatpush2.msra.mxu1 %v1268_v37  ;;  %v1253_v51 = vld [vmem:[#allocation2 + $0x708] sm:$0xff]  ;;  %v1112_v52 = vld [vmem:[#allocation2 + $0x2a0] sm:$0xff]  ;;  %v2772_v37 = vadd.s32 8, %v2750_v23 }
  0x59   : > { %1351 = vmatprep.subr.mxu0 %v1129_v34  ;;  %1424 = vmatprep.subr.mxu1 %v1265_v39  ;;  %v1252_v53 = vld [vmem:[#allocation2 + $0x700] sm:$0xff]  ;;  %v1109_v54 = vld [vmem:[#allocation2 + $0x288] sm:$0xff]  ;;  %v2763_v34 = vsub.s32 0, %v2750_v23  ;;  %3747 = vst [vmem:[#allocation9_spill] sm:$0xff] %v2766_v35 }
  0x5a   : > { %1352 = vmatpush2.msra.mxu0 %v1128_v36  ;;  %1425 = vmatpush2.msra.mxu1 %v1264_v41  ;;  %v1249_v55 = vld [vmem:[#allocation2 + $0x6e8] sm:$0xff]  ;;  %v1108_v56 = vld [vmem:[#allocation2 + $0x280] sm:$0xff]  ;;  %v2769_v36 = vsub.s32 2, %v2750_v23  ;;  %vm664_vm3 = vcmp.lt.s32.totalorder %v2772_v37, 15 }
  0x5b   : > { %1353 = vmatprep.subr.mxu0 %v1125_v38  ;;  %1426 = vmatprep.subr.mxu1 %v1261_v43  ;;  %v1248_v57 = vld [vmem:[#allocation2 + $0x6e0] sm:$0xff]  ;;  %v1105_v58 = vld [vmem:[#allocation2 + $0x268] sm:$0xff]  ;;  %3746 = vst [vmem:[#allocation8_spill] sm:$0xff] %v2763_v34  ;;  %v2775_v38 = vsub.s32 3, %v2750_v23 }
  0x5c   : > { %1354 = vmatpush2.msra.mxu0 %v1124_v40  ;;  %1427 = vmatpush2.msra.mxu1 %v1260_v45  ;;  %v1245_v59 = vld [vmem:[#allocation2 + $0x6c8] sm:$0xff]  ;;  %v1104_v60 = vld [vmem:[#allocation2 + $0x260] sm:$0xff]  ;;  %3748 = vst [vmem:[#allocation10_spill] sm:$0xff] %v2769_v36  ;;  %v433_v40 = vsel %vm365_vm0, %v425_v26, %v421_v25  ;;  %v422_v45 = vrot.slane %v2728_v7, 7 }
  0x5d   : > { %1355 = vmatprep.subr.mxu0 %v1121_v42  ;;  %1428 = vmatprep.subr.mxu1 %v1257_v47  ;;  %v1244_v61 = vld [vmem:[#allocation2 + $0x6c0] sm:$0xff]  ;;  %v1101_v62 = vld [vmem:[#allocation2 + $0x248] sm:$0xff]  ;;  %3749 = vst [vmem:[#allocation11_spill] sm:$0xff] %v2775_v38  ;;  %v426_v47 = vrot.slane %v2725_v6, 7 }
  0x5e   : > { %1356 = vmatpush2.msra.mxu0 %v1120_v44  ;;  %1429 = vmatpush2.msra.mxu1 %v1256_v49  ;;  %v1241_v63 = vld [vmem:[#allocation2 + $0x6a8] sm:$0xff]  ;;  %v1100_v8 = vld [vmem:[#allocation2 + $0x240] sm:$0xff]  ;;  %v432_v44 = vsel %vm365_vm0, %v424_v28, %v420_v29 }
  0x5f   : > { %1357 = vmatprep.subr.mxu0 %v1117_v46  ;;  %1430 = vmatprep.subr.mxu1 %v1253_v51  ;;  %v1240_v9 = vld [vmem:[#allocation2 + $0x6a0] sm:$0xff]  ;;  %v1097_v10 = vld [vmem:[#allocation2 + $0x228] sm:$0xff]  ;;  %v423_v46 = vrot.slane %v2718_v5, 7  ;;  %v437_v51 = vsel %vm355_vm2, %v433_v40, 0.0  ;;  %v729_v40 = vrot.slane %v2698_v1, 1 }
  0x60   : > { %1358 = vmatpush2.msra.mxu0 %v1116_v48  ;;  %1431 = vmatpush2.msra.mxu1 %v1252_v53  ;;  %v1237_v11 = vld [vmem:[#allocation2 + $0x688] sm:$0xff]  ;;  %v1096_v12 = vld [vmem:[#allocation2 + $0x220] sm:$0xff]  ;;  %v427_v48 = vrot.slane %v2715_v4, 7 }
  0x61   : > { %1359 = vmatprep.subr.mxu0 %v1113_v50  ;;  %1432 = vmatprep.subr.mxu1 %v1249_v55  ;;  %v1236_v13 = vld [vmem:[#allocation2 + $0x680] sm:$0xff]  ;;  %v1093_v14 = vld [vmem:[#allocation2 + $0x208] sm:$0xff]  ;;  %v429_v50 = vsel %vm365_vm0, %v421_v25, %v425_v26  ;;  %v428_v55 = vsel %vm365_vm0, %v420_v29, %v424_v28 }
  0x62   : > { %1360 = vmatpush2.msra.mxu0 %v1112_v52  ;;  %1433 = vmatpush2.msra.mxu1 %v1248_v57  ;;  %v1233_v15 = vld [vmem:[#allocation2 + $0x668] sm:$0xff]  ;;  %v1092_v16 = vld [vmem:[#allocation2 + $0x200] sm:$0xff] }
  0x63   : > { %1361 = vmatprep.subr.mxu0 %v1109_v54  ;;  %1434 = vmatprep.subr.mxu1 %v1245_v59  ;;  %v1232_v18 = vld [vmem:[#allocation2 + $0x660] sm:$0xff]  ;;  %v1229_v20 = vld [vmem:[#allocation2 + $0x648] sm:$0xff]  ;;  %v730_v59 = vrot.slane %v2695_v0, 1 }
  0x64   : > { %1362 = vmatpush2.msra.mxu0 %v1108_v56  ;;  %1435 = vmatpush2.msra.mxu1 %v1244_v61  ;;  %v1228_v21 = vld [vmem:[#allocation2 + $0x640] sm:$0xff]  ;;  %v1225_v22 = vld [vmem:[#allocation2 + $0x628] sm:$0xff]  ;;  %v436_v56 = vsel %vm355_vm2, %v432_v44, 0.0 }
  0x65   : > { %1363 = vmatprep.subr.mxu0 %v1105_v58  ;;  %1436 = vmatprep.subr.mxu1 %v1241_v63  ;;  %v1224_v24 = vld [vmem:[#allocation2 + $0x620] sm:$0xff]  ;;  %v1221_v27 = vld [vmem:[#allocation2 + $0x608] sm:$0xff]  ;;  %v434_v63 = vsel %vm365_vm0, %v426_v47, %v422_v45 }
  0x66   : > { %1364 = vmatpush2.msra.mxu0 %v1104_v60  ;;  %1437 = vmatpush2.msra.mxu1 %v1240_v9  ;;  %v1220_v30 = vld [vmem:[#allocation2 + $0x600] sm:$0xff]  ;;  %v734_v60 = vrot.slane %v2705_v2, 1 }
  0x67   : > { %1365 = vmatprep.subr.mxu0 %v1101_v62  ;;  %1438 = vmatprep.subr.mxu1 %v1237_v11  ;;  %v2256_v32 = vld [vmem:[%s3719_s1 + $0x1] ss:$8 sm:$0xf]  ;;  %v2258_v39 = vld [vmem:[%s3719_s1 + $0x3] ss:$8 sm:$0xf] }
  0x68   : > { %1366 = vmatpush2.msra.mxu0 %v1100_v8  ;;  %1439 = vmatpush2.msra.mxu1 %v1236_v13  ;;  %v382_v41 = vld [vmem:[%s3719_s1] ss:$8 sm:$0xf]  ;;  %v454_v42 = vrot.slane %v2256_v32, %v2766_v35  ;;  %v2261_v43 = vld [vmem:[%s3719_s1 + $0x6] ss:$8 sm:$0xf]  ;;  %v2798_v49 = vrot.slane %v2258_v39, %v2766_v35  ;;  %v450_v52 = vrot.slane %v2256_v32, %v2763_v34 }
  0x69   : > { %1367 = vmatprep.subr.mxu0 %v1097_v10  ;;  %1440 = vmatprep.subr.mxu1 %v1233_v15  ;;  %v2807_v53 = vrot.slane %v382_v41, %v2766_v35  ;;  %v2810_v54 = vrot.slane %v2258_v39, %v2763_v34  ;;  %v2817_v57 = vrot.slane %v2261_v43, %v2766_v35  ;;  %v2259_v13 = vld [vmem:[%s3719_s1 + $0x4] ss:$8 sm:$0xf]  ;;  %v2260_v26 = vld [vmem:[%s3719_s1 + $0x5] ss:$8 sm:$0xf] }
  0x6a   : > { %1368 = vmatpush2.msra.mxu0 %v1096_v12  ;;  %1441 = vmatpush2.msra.mxu1 %v1232_v18  ;;  %v2820_v58 = vrot.slane %v382_v41, %v2763_v34  ;;  %v2824_v61 = vmul.f32 %v454_v42, %v437_v51  ;;  %v2827_v62 = vrot.slane %v2261_v43, %v2763_v34 }
  0x6b   : > { %1369 = vmatprep.subr.mxu0 %v1093_v14  ;;  %1442 = vmatprep.subr.mxu1 %v1229_v20  ;;  %v435_v8 = vsel %vm365_vm0, %v427_v48, %v423_v46  ;;  %v2833_v9 = vmul.f32 %v454_v42, %v429_v50  ;;  %v2835_v10 = vmul.f32 %v450_v52, %v436_v56  ;;  %v2848_v14 = vld [vmem:[%s3719_s1 + $0x7] ss:$8 sm:$0xf]  ;;  %v438_v20 = vsel %vm355_vm2, %v434_v63, 0.0 }
  0x6c   : > { %1370 = vmatpush2.msra.mxu0 %v1092_v16  ;;  %1443 = vmatpush2.msra.mxu1 %v1228_v21  ;;  %v2837_v11 = vmul.f32 %v450_v52, %v428_v55  ;;  %v2840_v12 = vrot.slane %v2258_v39, %v2769_v36  ;;  %v2851_v15 = vrot.slane %v2258_v39, %v2775_v38  ;;  %v439_v21 = vsel %vm355_vm2, %v435_v8, 0.0 }
  0x6d   : > { %1461 = vmatprep.subr.mxu0 %v1091_v19  ;;  %1444 = vmatprep.subr.mxu1 %v1225_v22  ;;  %v430_v16 = vsel %vm365_vm0, %v422_v45, %v426_v47  ;;  %v458_v17 = vrot.slane %v2256_v32, %v2769_v36  ;;  %v462_v18 = vrot.slane %v2256_v32, %v2775_v38  ;;  %v733_v39 = vrot.slane %v2708_v3, 1 }
  0x6e   : > { %1445 = vmatpush2.msra.mxu1 %v1224_v24  ;;  %v431_v19 = vsel %vm365_vm0, %v423_v46, %v427_v48  ;;  %v742_v22 = vsel %vm673_vm1, %v734_v60, %v730_v59  ;;  %v2866_v24 = vrot.slane %v382_v41, %v2769_v36  ;;  %v2869_v25 = vrot.slane %v382_v41, %v2775_v38  ;;  %v2264_v46 = vld [vmem:[%s3719_s1 + $0x21] ss:$8 sm:$0xf] }
  0x6f   : > { %1446 = vmatprep.subr.mxu1 %v1221_v27  ;;  %v2257_v27 = vld [vmem:[%s3719_s1 + $0x2] ss:$8 sm:$0xf]  ;;  %v595_v28 = vrot.slane %v2259_v13, %v2766_v35  ;;  %v763_v29 = vrot.slane %v2848_v14, %v2766_v35  ;;  %v738_v32 = vsel %vm673_vm1, %v730_v59, %v734_v60  ;;  %v2891_v41 = vmul.f32 %v458_v17, %v430_v16 }
  0x70   : > { %1447 = vmatpush2.msra.mxu1 %v1220_v30  ;;  %v2882_v30 = vrot.slane %v2261_v43, %v2769_v36  ;;  %v2893_v42 = vmul.f32 %v462_v18, %v431_v19  ;;  %v2896_v44 = vrot.slane %v2261_v43, %v2775_v38  ;;  %v750_v45 = vsel %vm664_vm3, %v742_v22, 0.0 }
  0x71   : > { %1538 = vmatprep.subr.mxu1 %v1219_v33  ;;  %v2263_v33 = vld [vmem:[%s3719_s1 + $0x20] ss:$8 sm:$0xf]  ;;  %v2903_v47 = vmul.f32 %v458_v17, %v438_v20  ;;  %v2905_v48 = vmul.f32 %v462_v18, %v439_v21  ;;  %v2908_v50 = vrot.slane %v2260_v26, %v2766_v35  ;;  %v2911_v51 = vrot.slane %v2257_v27, %v2766_v35 }
  0x72   : > { %v2914_v43 = vmul.f32 %v595_v28, %v2695_v0  ;;  %v2917_v52 = vmul.f32 %v595_v28, %v2705_v2  ;;  %v2919_v55 = vmul.f32 %v763_v29, %v738_v32  ;;  %v591_v56 = vrot.slane %v2259_v13, %v2763_v34 }
  0x73   : > { %v2922_v59 = vmul.f32 %v763_v29, %v750_v45  ;;  %v2925_v60 = vrot.slane %v2263_v33, %v2766_v35  ;;  %v2928_v63 = vrot.slane %v2264_v46, %v2766_v35  ;;  %v741_v8 = vsel %vm673_vm1, %v733_v39, %v729_v40 }
  0x74   : > { %3750 = vst [vmem:[#allocation12_spill] sm:$0xff] %v2919_v55  ;;  %v2933_v0 = vrot.slane %v2260_v26, %v2763_v34  ;;  %v2936_v2 = vrot.slane %v2257_v27, %v2763_v34  ;;  %v2939_v16 = vrot.slane %v2263_v33, %v2763_v34  ;;  %v2942_v17 = vadd.s32 384, %v2757_v31 }
  0x75   : > { %3751 = vst [vmem:[#allocation13_spill] sm:$0xff] %v2928_v63  ;;  %v759_v18 = vrot.slane %v2848_v14, %v2763_v34  ;;  %v2947_v19 = vrot.slane %v2260_v26, %v2769_v36  ;;  %v2950_v20 = vrot.slane %v2260_v26, %v2775_v38  ;;  %v599_v21 = vrot.slane %v2259_v13, %v2769_v36 }
  0x76   : > { %v2954_v22 = vmul.f32 %v591_v56, %v2708_v3  ;;  %v749_v28 = vsel %vm664_vm3, %v741_v8, 0.0  ;;  %v2959_v29 = vrot.slane %v2257_v27, %v2769_v36  ;;  %v2962_v32 = vrot.slane %v2263_v33, %v2769_v36 }
  0x77   : > { %3752 = vst [vmem:[#allocation14_spill] sm:$0xff] %v2947_v19  ;;  %3753 = vst [vmem:[#allocation15_spill] sm:$0xff] %v2950_v20  ;;  %v737_v26 = vsel %vm673_vm1, %v729_v40, %v733_v39  ;;  %v603_v3 = vrot.slane %v2259_v13, %v2775_v38  ;;  %v731_v63 = vrot.slane %v2728_v7, 1  ;;  %v735_v8 = vrot.slane %v2725_v6, 1 }
  0x78   : > { %3754 = vst [vmem:[#allocation16_spill] sm:$0xff] %v2959_v29  ;;  %3755 = vst [vmem:[#allocation17_spill] sm:$0xff] %v2962_v32  ;;  %v2973_v20 = vmul.f32 %v591_v56, %v2698_v1  ;;  %v2976_v29 = vrot.slane %v2257_v27, %v2775_v38  ;;  %v732_v32 = vrot.slane %v2718_v5, 1  ;;  %v736_v19 = vrot.slane %v2715_v4, 1 }
  0x79   : > { %v2981_v55 = vrot.slane %v2264_v46, %v2763_v34  ;;  %v2983_v39 = vmul.f32 %v759_v18, %v749_v28  ;;  %v2986_v13 = vmul.f32 %v599_v21, %v2725_v6  ;;  %v2989_v40 = vrot.slane %v2263_v33, %v2775_v38 }
  0x7a   : > { %3756 = vst [vmem:[#allocation18_spill] sm:$0xff] %v2976_v29  ;;  %v2994_v27 = vmul.f32 %v759_v18, %v737_v26  ;;  %v2997_v56 = vmul.f32 %v599_v21, %v2728_v7  ;;  %v767_v34 = vrot.slane %v2848_v14, %v2769_v36  ;;  %v3002_v6 = vmul.f32 %v603_v3, %v2718_v5 }
  0x7b   : > { %3757 = vst [vmem:[#allocation19_spill] sm:$0xff] %v2981_v55  ;;  %3758 = vst [vmem:[#allocation20_spill] sm:$0xff] %v2983_v39  ;;  %v3005_v33 = vmul.f32 %v603_v3, %v2715_v4  ;;  %v743_v18 = vsel %vm673_vm1, %v735_v8, %v731_v63  ;;  %v740_v21 = vsel %vm673_vm1, %v732_v32, %v736_v19  ;;  %vm321_vm7 = vcmp.lt.s32.totalorder %v2942_v17, 480 }
  0x7c   : > { %3759 = vst [vmem:[#allocation21_spill] sm:$0xff] %v2986_v13  ;;  %3760 = vst [vmem:[#allocation22_spill] sm:$0xff] %v2989_v40  ;;  %v739_v40 = vsel %vm673_vm1, %v731_v63, %v735_v8  ;;  %v744_v26 = vsel %vm673_vm1, %v736_v19, %v732_v32  ;;  %v771_v5 = vrot.slane %v2848_v14, %v2775_v38 }
  0x7d   : > { %3761 = vst [vmem:[#allocation23_spill] sm:$0xff] %v2994_v27  ;;  %3762 = vst [vmem:[#allocation24_spill] sm:$0xff] %v2997_v56  ;;  %v751_v56 = vsel %vm664_vm3, %v743_v18, 0.0  ;;  %v3021_v63 = vmul.f32 %v767_v34, %v739_v40  ;;  %v3024_v8 = vrot.slane %v2264_v46, %v2769_v36  ;;  %v3027_v13 = vrot.slane %v2264_v46, %v2775_v38 }
  0x7e   : > { %3763 = vst [vmem:[#allocation25_spill] sm:$0xff] %v3002_v6  ;;  %3764 = vst [vmem:[#allocation26_spill] sm:$0xff] %v3005_v33  ;;  %v752_v40 = vsel %vm664_vm3, %v744_v26, 0.0  ;;  %v3042_v38 = vmul.f32 %v771_v5, %v740_v21 }
  0x7f   : > { %3765 = vst [vmem:[#allocation27_spill] sm:$0xff] %v3021_v63  ;;  %3766 = vst [vmem:[#allocation28_spill] sm:$0xff] %v3024_v8  ;;  %v3057_v21 = vmul.f32 %v771_v5, %v752_v40 }
  0x80   : > { %3767 = vst [vmem:[#allocation29_spill] sm:$0xff] %v3027_v13  ;;  %3768 = vst [vmem:[#allocation30_spill] sm:$0xff] %v3042_v38 }
  0x81   : > { %3770 = vst [vmem:[#allocation32_spill] sm:$0xff] %v3057_v21 }
  0x9d   : > { %v2964_v45 = vpop.permute.xlu1 %289  ;;  %v286_v35 = vpop.permute.xlu0 %285 }
  0x9e   : > { %v306_v1 = vsel %vm301_vm4, %v286_v35, %v2964_v45 }
  0x9f   : > { %v358_v4 = vrot.slane %v306_v1, 7  ;;  %v666_v3 = vrot.slane %v306_v1, 1 }
  0xa1   : > { %v292_v28 = vpop.permute.xlu1 %291  ;;  %v288_v55 = vpop.permute.xlu0 %287 }
  0xa2   : > { %v307_v7 = vsel %vm301_vm4, %v288_v55, %v292_v28 }
  0xa3   : > { %v362_v33 = vrot.slane %v307_v7, 7  ;;  %v670_v6 = vrot.slane %v307_v7, 1 }
  0xa5   : > { %v367_v19 = vsel %vm365_vm0, %v358_v4, %v362_v33  ;;  %v371_v14 = vsel %vm365_vm0, %v362_v33, %v358_v4  ;;  %v679_v32 = vsel %vm673_vm1, %v670_v6, %v666_v3  ;;  %v300_v29 = vpop.permute.xlu1 %299  ;;  %v298_v39 = vpop.permute.xlu0 %297  ;;  %v675_v36 = vsel %vm673_vm1, %v666_v3, %v670_v6 }
  0xa6   : > { %v375_v18 = vsel %vm355_vm2, %v371_v14, 0.0  ;;  %v409_v46 = vmul.f32 %v2807_v53, %v367_v19  ;;  %v687_v4 = vsel %vm664_vm3, %v679_v32, 0.0  ;;  %v309_v13 = vsel %vm301_vm4, %v300_v29, %v288_v55 }
  0xa7   : > { %v405_v33 = vmul.f32 %v2807_v53, %v375_v18  ;;  %v308_v26 = vsel %vm301_vm4, %v298_v39, %v286_v35  ;;  %v314_v14 = vsel %vm281_vm5, %v309_v13, 0.0  ;;  %v3055_v6 = vmul.f32 %v767_v34, %v751_v56 }
  0xa8   : > { %v310_v19 = vsel %vm281_vm5, %v308_v26, 0.0  ;;  %v3060_v53 = vmul.f32 %v2798_v49, %v306_v1  ;;  %v3063_v3 = vmul.f32 %v2798_v49, %v307_v7  ;;  %v361_v55 = vrot.slane %v314_v14, 7 }
  0xa9   : > { %3769 = vst [vmem:[#allocation31_spill] sm:$0xff] %v3055_v6  ;;  %v669_v32 = vrot.slane %v314_v14, 1  ;;  %v296_v18 = vpop.permute.xlu1 %295  ;;  %v294_v35 = vpop.permute.xlu0 %293  ;;  %v3066_v8 = vmul.f32 %v2817_v57, %v675_v36  ;;  %v3069_v13 = vmul.f32 %v2817_v57, %v687_v4  ;;  %v357_v34 = vrot.slane %v310_v19, 7 }
  0xaa   : > { %v665_v56 = vrot.slane %v310_v19, 1  ;;  %v3072_v5 = vadd.f32 %v2824_v61, %v405_v33  ;;  %v3075_v1 = vadd.f32 %v2833_v9, %v409_v46  ;;  %v303_v49 = vsel %vm301_vm4, %v296_v18, %v300_v29 }
  0xab   : > { %v305_v7 = vsel %vm301_vm4, %v292_v28, %v296_v18  ;;  %v3082_v36 = vmul.f32 %v2810_v54, %v314_v14  ;;  %v366_v57 = vsel %vm365_vm0, %v357_v34, %v361_v55  ;;  %v370_v40 = vsel %vm365_vm0, %v361_v55, %v357_v34 }
  0xac   : > { %v678_v61 = vsel %vm673_vm1, %v669_v32, %v665_v56  ;;  %v374_v9 = vsel %vm355_vm2, %v370_v40, 0.0  ;;  %v408_v29 = vmul.f32 %v2820_v58, %v366_v57  ;;  %v3094_v46 = vmul.f32 %v2810_v54, %v310_v19 }
  0xad   : > { %v686_v28 = vsel %vm664_vm3, %v678_v61, 0.0  ;;  %v329_v33 = vpop.permute.xlu1 %328  ;;  %v327_v4 = vpop.permute.xlu0 %326  ;;  %v363_v26 = vrot.slane %v305_v7, 7  ;;  %v364_v14 = vrot.slane %v303_v49, 7  ;;  %v3100_v55 = vmul.f32 %v2851_v15, %v303_v49 }
  0xae   : > { %v672_v18 = vrot.slane %v303_v49, 1  ;;  %v404_v34 = vmul.f32 %v2820_v58, %v374_v9  ;;  %v674_v57 = vsel %vm673_vm1, %v665_v56, %v669_v32  ;;  %v302_v54 = vsel %vm301_vm4, %v294_v35, %v298_v39 }
  0xaf   : > { %3771 = vst [vmem:[#allocation33_spill] sm:$0xff] %v3100_v55  ;;  %v304_v19 = vsel %vm301_vm4, %v2964_v45, %v294_v35  ;;  %v3111_v40 = vmul.f32 %v2827_v62, %v686_v28  ;;  %v3114_v61 = vmul.f32 %v2840_v12, %v305_v7  ;;  %v360_v49 = vrot.slane %v302_v54, 7 }
  0xb0   : > { %v359_v21 = vrot.slane %v304_v19, 7  ;;  %v3117_v58 = vadd.f32 %v2837_v11, %v408_v29  ;;  %v671_v9 = vrot.slane %v305_v7, 1  ;;  %v667_v32 = vrot.slane %v304_v19, 1 }
  0xb1   : > { %3772 = vst [vmem:[#allocation34_spill] sm:$0xff] %v3114_v61  ;;  %v668_v56 = vrot.slane %v302_v54, 1  ;;  %v3119_v38 = vpop.permute.xlu1 %332  ;;  %v3121_v39 = vpop.permute.xlu0 %330  ;;  %v369_v35 = vsel %vm365_vm0, %v360_v49, %v364_v14  ;;  %v373_v11 = vsel %vm365_vm0, %v364_v14, %v360_v49  ;;  %v475_v55 = vadd.f32 %v2835_v10, %v404_v34 }
  0xb2   : > { %v368_v45 = vsel %vm365_vm0, %v359_v21, %v363_v26  ;;  %v372_v28 = vsel %vm365_vm0, %v363_v26, %v359_v21  ;;  %v377_v29 = vsel %vm355_vm2, %v373_v11, 0.0  ;;  %v411_v6 = vmul.f32 %v2869_v25, %v369_v35 }
  0xb3   : > { %v376_v7 = vsel %vm355_vm2, %v372_v28, 0.0  ;;  %v410_v63 = vmul.f32 %v2866_v24, %v368_v45  ;;  %v407_v27 = vmul.f32 %v2869_v25, %v377_v29  ;;  %v3141_v21 = vmul.f32 %v2827_v62, %v674_v57 }
  0xb4   : > { %v406_v61 = vmul.f32 %v2866_v24, %v376_v7  ;;  %v3144_v26 = vmul.f32 %v2840_v12, %v304_v19  ;;  %v3147_v14 = vmul.f32 %v2851_v15, %v302_v54  ;;  %v680_v49 = vsel %vm673_vm1, %v671_v9, %v667_v32 }
  0xb5   : > { %v681_v45 = vsel %vm673_vm1, %v672_v18, %v668_v56  ;;  %v325_v10 = vpop.permute.xlu1 %324  ;;  %v3153_v34 = vpop.permute.xlu0 %322  ;;  %v3156_v24 = vadd.f32 %v2891_v41, %v410_v63  ;;  %v3159_v62 = vadd.f32 %v2893_v42, %v411_v6  ;;  %v676_v12 = vsel %vm673_vm1, %v667_v32, %v671_v9 }
  0xb6   : > { %v677_v15 = vsel %vm673_vm1, %v668_v56, %v672_v18  ;;  %v3166_v25 = vadd.f32 %v2903_v47, %v406_v61  ;;  %v3169_v57 = vadd.f32 %v2905_v48, %v407_v27  ;;  %v688_v54 = vsel %vm664_vm3, %v680_v49, 0.0 }
  0xb7   : > { %v689_v41 = vsel %vm664_vm3, %v681_v45, 0.0  ;;  %v342_v42 = vsel %vm338_vm6, %v329_v33, %v3119_v38  ;;  %v341_v63 = vsel %vm338_vm6, %v327_v4, %v3121_v39  ;;  %v344_v47 = vsel %vm338_vm6, %v325_v10, %v329_v33 }
  0xb8   : > { %v343_v48 = vsel %vm338_vm6, %v3153_v34, %v327_v4  ;;  %v3187_v27 = vmul.f32 %v2882_v30, %v676_v12  ;;  %v488_v6 = vrot.slane %v342_v42, 7  ;;  %v797_v18 = vrot.slane %v342_v42, 1 }
  0xb9   : > { %v484_v19 = vrot.slane %v341_v63, 7  ;;  %v3191_v61 = vmul.f32 %v2896_v44, %v677_v15  ;;  %v3194_v9 = vmul.f32 %v2882_v30, %v688_v54  ;;  %v793_v32 = vrot.slane %v341_v63, 1 }
  0xba   : > { %v487_v33 = vrot.slane %v344_v47, 7  ;;  %v3197_v56 = vmul.f32 %v2896_v44, %v689_v41  ;;  %v483_v28 = vrot.slane %v343_v48, 7  ;;  %v652_v11 = vmul.f32 %v2908_v50, %v342_v42 }
  0xbb   : > { %v492_v4 = vsel %vm365_vm0, %v484_v19, %v488_v6  ;;  %v496_v35 = vsel %vm365_vm0, %v488_v6, %v484_v19  ;;  %v648_v29 = vmul.f32 %v2908_v50, %v341_v63  ;;  %v805_v44 = vsel %vm673_vm1, %v797_v18, %v793_v32  ;;  %v337_v6 = vpop.permute.xlu1 %336 }
  0xbc   : > { %v500_v7 = vsel %vm355_vm2, %v496_v35, 0.0  ;;  %v535_v30 = vmul.f32 %v2911_v51, %v492_v4  ;;  %v796_v45 = vrot.slane %v344_v47, 1  ;;  %v491_v12 = vsel %vm365_vm0, %v483_v28, %v487_v33 }
  0xbd   : > { %v531_v49 = vmul.f32 %v2911_v51, %v500_v7  ;;  %v651_v54 = vmul.f32 %v2933_v0, %v344_v47  ;;  %v495_v41 = vsel %vm365_vm0, %v487_v33, %v483_v28  ;;  %v534_v42 = vmul.f32 %v2936_v2, %v491_v12 }
  0xbe   : > { %v543_v15 = vadd.f32 %v535_v30, %v3075_v1  ;;  %v801_v51 = vsel %vm673_vm1, %v793_v32, %v797_v18  ;;  %v499_v63 = vsel %vm355_vm2, %v495_v41, 0.0  ;;  %v792_v19 = vrot.slane %v343_v48, 1 }
  0xbf   : > { %v539_v50 = vadd.f32 %v531_v49, %v3072_v5  ;;  %v813_v1 = vsel %vm664_vm3, %v805_v44, 0.0  ;;  %v530_v47 = vmul.f32 %v2936_v2, %v499_v63  ;;  %v542_v33 = vadd.f32 %v534_v42, %v3117_v58  ;;  %v3774_v42 = vld [vmem:[#allocation14_spill] sm:$0xff]  ;;  %v3775_v63 = vld [vmem:[#allocation15_spill] sm:$0xff] }
  0xc0   : > { %v582_v4 = vadd.f32 %v3063_v3, %v543_v15  ;;  %v800_v5 = vsel %vm673_vm1, %v792_v19, %v796_v45  ;;  %v804_v18 = vsel %vm673_vm1, %v796_v45, %v792_v19  ;;  %v346_v32 = vsel %vm338_vm6, %v337_v6, %v325_v10 }
  0xc1   : > { %v578_v35 = vadd.f32 %v3060_v53, %v539_v50  ;;  %v538_v28 = vadd.f32 %v530_v47, %v475_v55  ;;  %v581_v7 = vadd.f32 %v3082_v36, %v542_v33  ;;  %v812_v2 = vsel %vm664_vm3, %v804_v18, 0.0  ;;  %v335_v55 = vpop.permute.xlu0 %334  ;;  %v3777_v33 = vld [vmem:[#allocation20_spill] sm:$0xff] }
  0xc2   : > { %v621_v3 = vadd.f32 %v2917_v52, %v582_v4  ;;  %v840_v53 = vmul.f32 %v2925_v60, %v801_v51  ;;  %v844_v30 = vmul.f32 %v2925_v60, %v813_v1  ;;  %v340_v49 = vsel %vm338_vm6, %v3119_v38, %v337_v6  ;;  %v3776_v1 = vld [vmem:[#allocation23_spill] sm:$0xff] }
  0xc3   : > { %v617_v58 = vadd.f32 %v2914_v43, %v578_v35  ;;  %v577_v10 = vadd.f32 %v3094_v46, %v538_v28  ;;  %v620_v52 = vadd.f32 %v2954_v22, %v581_v7  ;;  %v3249_v36 = vsel %vm321_vm7, %v346_v32, 0.0  ;;  %v3778_v28 = vld [vmem:[#allocation16_spill] sm:$0xff] }
  0xc4   : > { %v660_v44 = vadd.f32 %v652_v11, %v621_v3  ;;  %v647_v43 = vmul.f32 %v2933_v0, %v343_v48  ;;  %v839_v12 = vmul.f32 %v2939_v16, %v800_v5  ;;  %v843_v60 = vmul.f32 %v2939_v16, %v812_v2 }
  0xc5   : > { %v656_v45 = vadd.f32 %v648_v29, %v617_v58  ;;  %v616_v38 = vadd.f32 %v2973_v20, %v577_v10  ;;  %v659_v11 = vadd.f32 %v651_v54, %v620_v52  ;;  %v489_v46 = vrot.slane %v340_v49, 7  ;;  %v3773_v54 = vld [vmem:[#allocation12_spill] sm:$0xff] }
  0xc6   : > { %v726_v15 = vadd.f32 %v3069_v13, %v660_v44  ;;  %v490_v41 = vrot.slane %v3249_v36, 7  ;;  %v339_v29 = vsel %vm338_vm6, %v3121_v39, %v335_v55  ;;  %v345_v0 = vsel %vm338_vm6, %v335_v55, %v3153_v34  ;;  %v3780_v55 = vld [vmem:[#allocation13_spill] sm:$0xff] }
  0xc7   : > { %v722_v22 = vadd.f32 %v3066_v8, %v656_v45  ;;  %v655_v48 = vadd.f32 %v647_v43, %v616_v38  ;;  %v725_v13 = vadd.f32 %v3111_v40, %v659_v11  ;;  %v350_v20 = vsel %vm321_vm7, %v345_v0, 0.0 }
  0xc8   : > { %v789_v16 = vadd.f32 %v2922_v59, %v726_v15  ;;  %v653_v6 = vmul.f32 %v3774_v42, %v340_v49  ;;  %v485_v50 = vrot.slane %v339_v29, 7  ;;  %v486_v51 = vrot.slane %v350_v20, 7 }
  0xc9   : > { %v785_v8 = vadd.f32 %v3773_v54, %v722_v22  ;;  %v721_v39 = vadd.f32 %v3141_v21, %v655_v48  ;;  %v654_v31 = vmul.f32 %v3775_v63, %v3249_v36  ;;  %v798_v34 = vrot.slane %v340_v49, 1  ;;  %v3784_v48 = vld [vmem:[#allocation21_spill] sm:$0xff] }
  0xca   : > { %v799_v59 = vrot.slane %v3249_v36, 1  ;;  %v852_v19 = vadd.f32 %v844_v30, %v789_v16  ;;  %v493_v40 = vsel %vm365_vm0, %v485_v50, %v489_v46  ;;  %v497_v17 = vsel %vm365_vm0, %v489_v46, %v485_v50  ;;  %v3779_v30 = vld [vmem:[#allocation18_spill] sm:$0xff]  ;;  %v3783_v16 = vld [vmem:[#allocation33_spill] sm:$0xff] }
  0xcb   : > { %v649_v4 = vmul.f32 %v3774_v42, %v339_v29  ;;  %v784_v47 = vadd.f32 %v3776_v1, %v721_v39  ;;  %v788_v35 = vadd.f32 %v3777_v33, %v725_v13  ;;  %v494_v21 = vsel %vm365_vm0, %v486_v51, %v490_v41  ;;  %v3781_v46 = vld [vmem:[#allocation34_spill] sm:$0xff] }
  0xcc   : > { %v498_v5 = vsel %vm365_vm0, %v490_v41, %v486_v51  ;;  %v848_v18 = vadd.f32 %v840_v53, %v785_v8  ;;  %v501_v32 = vsel %vm355_vm2, %v497_v17, 0.0  ;;  %v536_v7 = vmul.f32 %v3778_v28, %v493_v40  ;;  %v3786_v8 = vld [vmem:[#allocation25_spill] sm:$0xff]  ;;  %v3787_v51 = vld [vmem:[#allocation26_spill] sm:$0xff] }
  0xcd   : > { %v502_v3 = vsel %vm355_vm2, %v498_v5, 0.0  ;;  %v847_v2 = vadd.f32 %v839_v12, %v784_v47  ;;  %v532_v58 = vmul.f32 %v3778_v28, %v501_v32  ;;  %v650_v44 = vmul.f32 %v3775_v63, %v350_v20  ;;  %v3789_v1 = vld [vmem:[#allocation22_spill] sm:$0xff]  ;;  %v3790_v28 = vld [vmem:[#allocation31_spill] sm:$0xff] }
  0xce   : > { %v533_v49 = vmul.f32 %v3779_v30, %v502_v3  ;;  %v537_v10 = vmul.f32 %v3779_v30, %v494_v21  ;;  %v544_v52 = vadd.f32 %v536_v7, %v3156_v24  ;;  %v794_v53 = vrot.slane %v339_v29, 1  ;;  %v3792_v30 = vld [vmem:[#allocation30_spill] sm:$0xff] }
  0xcf   : > { %v795_v36 = vrot.slane %v350_v20, 1  ;;  %v3296_v45 = vadd.f32 %v3780_v55, %v852_v19  ;;  %v851_v43 = vadd.f32 %v843_v60, %v788_v35  ;;  %v540_v15 = vadd.f32 %v532_v58, %v3166_v25  ;;  %v3788_v19 = vld [vmem:[#allocation17_spill] sm:$0xff] }
  0xd0   : > { %v541_v12 = vadd.f32 %v533_v49, %v3169_v57  ;;  %v3301_v38 = vadd.f32 %v3780_v55, %v848_v18  ;;  %v545_v11 = vadd.f32 %v537_v10, %v3159_v62  ;;  %v583_v22 = vadd.f32 %v3781_v46, %v544_v52  ;;  %v3782_v57 = vld [vmem:[#allocation19_spill] sm:$0xff] }
  0xd1   : > { %v802_v24 = vsel %vm673_vm1, %v794_v53, %v798_v34  ;;  %v579_v41 = vadd.f32 %v3144_v26, %v540_v15  ;;  %v806_v60 = vsel %vm673_vm1, %v798_v34, %v794_v53  ;;  %v807_v25 = vsel %vm673_vm1, %v799_v59, %v795_v36 }
  0xd2   : > { %v580_v29 = vadd.f32 %v3147_v14, %v541_v12  ;;  %v3314_v0 = vadd.f32 %v3782_v57, %v847_v2  ;;  %v584_v62 = vadd.f32 %v3783_v16, %v545_v11  ;;  %v622_v13 = vadd.f32 %v3784_v48, %v583_v22  ;;  %v3785_v14 = vld [vmem:[#allocation24_spill] sm:$0xff]  ;;  %v3791_v2 = vld [vmem:[#allocation27_spill] sm:$0xff] }
  0xd3   : > { %v803_v20 = vsel %vm673_vm1, %v795_v36, %v799_v59  ;;  %v3321_v26 = vadd.f32 %v3782_v57, %v851_v43  ;;  %v618_v54 = vadd.f32 %v3785_v14, %v579_v41  ;;  %v814_v50 = vsel %vm664_vm3, %v806_v60, 0.0  ;;  %v3794_v22 = vld [vmem:[#allocation28_spill] sm:$0xff]  ;;  %v3795_v41 = vld [vmem:[#allocation29_spill] sm:$0xff] }
  0xd4   : > { %v619_v42 = vadd.f32 %v3786_v8, %v580_v29  ;;  %v623_v39 = vadd.f32 %v3787_v51, %v584_v62  ;;  %v661_v63 = vadd.f32 %v653_v6, %v622_v13  ;;  %v815_v34 = vsel %vm664_vm3, %v807_v25, 0.0 }
  0xd5   : > { %v841_v40 = vmul.f32 %v3788_v19, %v802_v24  ;;  %v657_v17 = vadd.f32 %v649_v4, %v618_v54  ;;  %v842_v47 = vmul.f32 %v3789_v1, %v803_v20  ;;  %v895_v33 = vmul.f32 0.044715, %v3301_v38 }
  0xd6   : > { %v658_v59 = vadd.f32 %v650_v44, %v619_v42  ;;  %v662_v35 = vadd.f32 %v654_v31, %v623_v39  ;;  %v727_v21 = vadd.f32 %v3194_v9, %v661_v63  ;;  %v845_v5 = vmul.f32 %v3788_v19, %v814_v50  ;;  %v3793_v44 = vld [vmem:[#allocation32_spill] sm:$0xff] }
  0xd7   : > { %v894_v18 = vmul.f32 0.044715, %v3314_v0  ;;  %v723_v6 = vadd.f32 %v3187_v27, %v657_v17  ;;  %v903_v32 = vmul.f32 %v895_v33, %v3301_v38  ;;  %v899_v4 = vmul.f32 0.044715, %v3296_v45 }
  0xd8   : > { %v724_v37 = vadd.f32 %v3191_v61, %v658_v59  ;;  %v728_v3 = vadd.f32 %v3197_v56, %v662_v35  ;;  %v790_v7 = vadd.f32 %v3790_v28, %v727_v21  ;;  %v846_v31 = vmul.f32 %v3789_v1, %v815_v34 }
  0xd9   : > { %v902_v9 = vmul.f32 %v894_v18, %v3314_v0  ;;  %v786_v58 = vadd.f32 %v3791_v2, %v723_v6  ;;  %v911_v27 = vmul.f32 %v903_v32, %v3301_v38  ;;  %v907_v61 = vmul.f32 %v899_v4, %v3296_v45  ;;  %v2265_v6 = vld [vmem:[%s3719_s1 + $0x22] ss:$8 sm:$0xf]  ;;  %v2266_v4 = vld [vmem:[%s3719_s1 + $0x23] ss:$8 sm:$0xf] }
  0xda   : > { %v787_v49 = vadd.f32 %v3792_v30, %v724_v37  ;;  %v791_v10 = vadd.f32 %v3793_v44, %v728_v3  ;;  %v853_v52 = vadd.f32 %v845_v5, %v790_v7  ;;  %v898_v56 = vmul.f32 0.044715, %v3321_v26 }
  0xdb   : > { %v910_v53 = vmul.f32 %v902_v9, %v3314_v0  ;;  %v849_v36 = vadd.f32 %v841_v40, %v786_v58  ;;  %v919_v43 = vadd.f32 %v911_v27, %v3301_v38  ;;  %v915_v15 = vmul.f32 %v907_v61, %v3296_v45 }
  0xdc   : > { %v850_v55 = vadd.f32 %v842_v47, %v787_v49  ;;  %v854_v12 = vadd.f32 %v846_v31, %v791_v10  ;;  %v906_v46 = vmul.f32 %v898_v56, %v3321_v26  ;;  %v3363_v57 = vadd.f32 %v3794_v22, %v853_v52  ;;  %v3796_v31 = vld [vmem:[#allocation9_spill] sm:$0xff]  ;;  %v3797_v49 = vld [vmem:[#allocation8_spill] sm:$0xff] }
  0xdd   : > { %v918_v11 = vadd.f32 %v910_v53, %v3314_v0  ;;  %v3356_v24 = vadd.f32 %v3794_v22, %v849_v36  ;;  %v927_v60 = vmul.f32 0.7978846, %v919_v43  ;;  %v923_v25 = vadd.f32 %v915_v15, %v3296_v45 }
  0xde   : > { %v3359_v29 = vadd.f32 %v3795_v41, %v850_v55  ;;  %v3366_v16 = vadd.f32 %v3795_v41, %v854_v12  ;;  %v914_v48 = vmul.f32 %v906_v46, %v3321_v26  ;;  %v900_v39 = vmul.f32 0.044715, %v3363_v57  ;;  %v2469_v41 = vld [vmem:[%s2692_s26 + $0x8] sm:$0xff] }
  0xdf   : > { %v926_v62 = vmul.f32 0.7978846, %v918_v11  ;;  %2413 = vtanh.f32 %v927_v60  ;;  %v931_v13 = vmul.f32 0.7978846, %v923_v25  ;;  %v896_v54 = vmul.f32 0.044715, %v3356_v24 }
  0xe0   : > { %v897_v20 = vmul.f32 0.044715, %v3359_v29  ;;  %v922_v14 = vadd.f32 %v914_v48, %v3321_v26  ;;  %v901_v42 = vmul.f32 0.044715, %v3366_v16  ;;  %v908_v40 = vmul.f32 %v900_v39, %v3363_v57 }
  0xe1   : > { %2415 = vtanh.f32 %v926_v62  ;;  %v904_v51 = vmul.f32 %v896_v54, %v3356_v24  ;;  %v887_v28 = vmul.f32 0.5, %v3301_v38  ;;  %v968_v9 = vrot.slane %v2265_v6, %v3796_v31  ;;  %v2470_v62 = vld [vmem:[%s2692_s26] sm:$0xff] }
  0xe2   : > { %2417 = vtanh.f32 %v931_v13  ;;  %v905_v8 = vmul.f32 %v897_v20, %v3359_v29  ;;  %v930_v50 = vmul.f32 0.7978846, %v922_v14  ;;  %v909_v34 = vmul.f32 %v901_v42, %v3366_v16  ;;  %v1090_v13 = vld [vmem:[#allocation2 + $0x1f0] sm:$0xff]  ;;  %v3798_v14 = vld [vmem:[#allocation11_spill] sm:$0xff] }
  0xe3   : > { %v912_v19 = vmul.f32 %v904_v51, %v3356_v24  ;;  %v916_v47 = vmul.f32 %v908_v40, %v3363_v57  ;;  %v886_v58 = vmul.f32 0.5, %v3314_v0  ;;  %v964_v27 = vrot.slane %v2265_v6, %v3797_v49 }
  0xe4   : > { %v913_v63 = vmul.f32 %v905_v8, %v3359_v29  ;;  %2419 = vtanh.f32 %v930_v50  ;;  %v917_v59 = vmul.f32 %v909_v34, %v3366_v16  ;;  %v999_v44 = vrot.slane %v2266_v4, %v3796_v31  ;;  %v1087_v50 = vld [vmem:[#allocation2 + $0x1d8] sm:$0xff] }
  0xe5   : > { %v920_v1 = vadd.f32 %v912_v19, %v3356_v24  ;;  %v924_v5 = vadd.f32 %v916_v47, %v3363_v57  ;;  %v891_v10 = vmul.f32 0.5, %v3296_v45  ;;  %v995_v38 = vrot.slane %v2266_v4, %v3797_v49  ;;  %v1086_v19 = vld [vmem:[#allocation2 + $0x1d0] sm:$0xff] }
  0xe6   : > { %v921_v17 = vadd.f32 %v913_v63, %v3359_v29  ;;  %v925_v35 = vadd.f32 %v917_v59, %v3366_v16  ;;  %v890_v0 = vmul.f32 0.5, %v3321_v26  ;;  %v976_v54 = vrot.slane %v2265_v6, %v3798_v14  ;;  %v2471_v26 = vld [vmem:[%s2692_s26 + $0x28] sm:$0xff] }
  0xe7   : > { %v928_v21 = vmul.f32 0.7978846, %v920_v1  ;;  %v932_v37 = vmul.f32 0.7978846, %v924_v5  ;;  %v889_v51 = vmul.f32 0.5, %v3359_v29  ;;  %v1007_v63 = vrot.slane %v2266_v4, %v3798_v14  ;;  %v3799_v1 = vld [vmem:[#allocation10_spill] sm:$0xff] }
  0xe8   : > { %v929_v33 = vmul.f32 0.7978846, %v921_v17  ;;  %v933_v18 = vmul.f32 0.7978846, %v925_v35  ;;  %v888_v17 = vmul.f32 0.5, %v3356_v24  ;;  %v972_v47 = vrot.slane %v2265_v6, %v3799_v1  ;;  %v1083_v35 = vld [vmem:[#allocation2 + $0x1b8] sm:$0xff] }
  0xe9   : > { %v893_v5 = vmul.f32 0.5, %v3366_v16  ;;  %v1078_v16 = vld [vmem:[#allocation2 + $0x190] sm:$0xff] }
  0xea   : > { %2421 = vtanh.f32 %v929_v33 }
  0xeb   : > { %2423 = vtanh.f32 %v928_v21  ;;  %v1003_v21 = vrot.slane %v2266_v4, %v3799_v1 }
  0xec   : > { %2425 = vtanh.f32 %v933_v18  ;;  %v2414_v32 = vpop.eup %2413 }
  0xed   : > { %2427 = vtanh.f32 %v932_v37  ;;  %v943_v7 = vadd.f32 1.0, %v2414_v32  ;;  %v2472_v37 = vld [vmem:[%s2692_s26 + $0x20] sm:$0xff] }
  0xee   : > { %v2416_v3 = vpop.eup %2415 }
  0xef   : > { %v2418_v2 = vpop.eup %2417  ;;  %v942_v30 = vadd.f32 1.0, %v2416_v3  ;;  %v951_v61 = vmul.f32 %v943_v7, %v887_v28  ;;  %v1082_v3 = vld [vmem:[#allocation2 + $0x1b0] sm:$0xff]  ;;  %v892_v28 = vmul.f32 0.5, %v3363_v57 }
  0xf0   : > { %v947_v52 = vadd.f32 1.0, %v2418_v2 }
  0xf1   : > { %v950_v53 = vmul.f32 %v942_v30, %v886_v58  ;;  %v2420_v56 = vpop.eup %2419  ;;  %v982_v36 = vmul.f32 %v968_v9, %v951_v61  ;;  %v1075_v61 = vld [vmem:[#allocation2 + $0x178] sm:$0xff] }
  0xf2   : > { %v955_v55 = vmul.f32 %v947_v52, %v891_v10  ;;  %v946_v15 = vadd.f32 1.0, %v2420_v56  ;;  %v2473_v52 = vld [vmem:[%s2692_s26 + $0x18] sm:$0xff] }
  0xf3   : > { %v981_v43 = vmul.f32 %v964_v27, %v950_v53  ;;  %v1013_v12 = vadd.f32 %v999_v44, %v982_v36  ;;  %v1071_v56 = vld [vmem:[#allocation2 + $0x158] sm:$0xff]  ;;  %v2474_v36 = vld [vmem:[%s2692_s26 + $0x10] sm:$0xff] }
  0xf4   : > { %v986_v11 = vmul.f32 %v968_v9, %v955_v55  ;;  %v954_v22 = vmul.f32 %v946_v15, %v890_v0  ;;  %v1079_v9 = vld [vmem:[#allocation2 + $0x198] sm:$0xff] }
  0xf5   : > { %v1012_v46 = vadd.f32 %v995_v38, %v981_v43  ;;  %v1021_v60 = vadd.f32 %v2469_v41, %v1013_v12  ;;  %v1218_v43 = vld [vmem:[#allocation2 + $0x5f0] sm:$0xff]  ;;  %v2475_v15 = vld [vmem:[%s2692_s26 + $0x38] sm:$0xff] }
  0xf6   : > { %v1017_v45 = vadd.f32 %v999_v44, %v986_v11  ;;  %v985_v20 = vmul.f32 %v964_v27, %v954_v22  ;;  %v1074_v44 = vld [vmem:[#allocation2 + $0x170] sm:$0xff]  ;;  %v1215_v11 = vld [vmem:[#allocation2 + $0x5d8] sm:$0xff] }
  0xf7   : > { %v2422_v25 = vpop.eup %2421  ;;  %v3402_v48 = vadd.f32 %v2470_v62, %v1012_v46  ;;  %1371 = vmatprep.mubr.f32.mxu0 %v1021_v60  ;;  %v1070_v46 = vld [vmem:[#allocation2 + $0x150] sm:$0xff]  ;;  %v1067_v41 = vld [vmem:[#allocation2 + $0x138] sm:$0xff] }
  0xf8   : > { %v2424_v8 = vpop.eup %2423  ;;  %v3406_v42 = vadd.f32 %v2471_v26, %v1017_v45  ;;  %v945_v39 = vadd.f32 1.0, %v2422_v25  ;;  %v1016_v40 = vadd.f32 %v995_v38, %v985_v20  ;;  %v1214_v22 = vld [vmem:[#allocation2 + $0x5d0] sm:$0xff]  ;;  %v1203_v26 = vld [vmem:[#allocation2 + $0x578] sm:$0xff] }
  0xf9   : > { %v2426_v34 = vpop.eup %2425  ;;  %1372 = vmatmul.mubr.f32.vlgmr.msra.gmra.mxu0 %v3402_v48  ;;  %v944_v59 = vadd.f32 1.0, %v2424_v8  ;;  %v2476_v45 = vld [vmem:[%s2692_s26 + $0x30] sm:$0xff]  ;;  %v1063_v8 = vld [vmem:[#allocation2 + $0x118] sm:$0xff] }
  0xfa   : > { %v2428_v33 = vpop.eup %2427  ;;  %1462 = vmatpush1.msra.mxu0 %v1090_v13  ;;  %1377 = vmatprep.mubr.f32.mxu0 %v3406_v42  ;;  %v953_v29 = vmul.f32 %v945_v39, %v889_v51  ;;  %v949_v18 = vadd.f32 1.0, %v2426_v34  ;;  %v3417_v32 = vadd.f32 %v2472_v37, %v1016_v40  ;;  %v1210_v62 = vld [vmem:[#allocation2 + $0x5b0] sm:$0xff]  ;;  %v1207_v13 = vld [vmem:[#allocation2 + $0x598] sm:$0xff] }
  0xfb   : > { %1463 = vmatprep.subr.mxu0 %v1087_v50  ;;  %v952_v24 = vmul.f32 %v944_v59, %v888_v17  ;;  %v948_v6 = vadd.f32 1.0, %v2428_v33  ;;  %v1066_v20 = vld [vmem:[#allocation2 + $0x130] sm:$0xff]  ;;  %v1059_v39 = vld [vmem:[#allocation2 + $0xf8] sm:$0xff] }
  0xfc   : > { %1464 = vmatpush1.msra.mxu0 %v1086_v19  ;;  %v984_v7 = vmul.f32 %v976_v54, %v953_v29  ;;  %v957_v2 = vmul.f32 %v949_v18, %v893_v5  ;;  %v1062_v50 = vld [vmem:[#allocation2 + $0x110] sm:$0xff]  ;;  %v1055_v40 = vld [vmem:[#allocation2 + $0xd8] sm:$0xff] }
  0xfd   : > { %1465 = vmatprep.subr.mxu0 %v1083_v35  ;;  %1378 = vmatmul.mubr.f32.gmra.mxu0 %v3417_v32  ;;  %v983_v4 = vmul.f32 %v972_v47, %v952_v24  ;;  %v956_v58 = vmul.f32 %v948_v6, %v892_v28  ;;  %v1202_v51 = vld [vmem:[#allocation2 + $0x570] sm:$0xff]  ;;  %v1195_v17 = vld [vmem:[#allocation2 + $0x538] sm:$0xff] }
  0xfe   : > { %1466 = vmatpush1.msra.mxu0 %v1082_v3  ;;  %v1015_v30 = vadd.f32 %v1007_v63, %v984_v7  ;;  %1525 = vmatprep.mubr.f32.mxu0 %v1021_v60  ;;  %v988_v27 = vmul.f32 %v976_v54, %v957_v2  ;;  %v1211_v60 = vld [vmem:[#allocation2 + $0x5b8] sm:$0xff]  ;;  %v1206_v54 = vld [vmem:[#allocation2 + $0x590] sm:$0xff] }
  0xff   : > { %1467 = vmatprep.subr.mxu0 %v1079_v9  ;;  %v1014_v57 = vadd.f32 %v1003_v21, %v983_v4  ;;  %v987_v10 = vmul.f32 %v972_v47, %v956_v58  ;;  %v1058_v34 = vld [vmem:[#allocation2 + $0xf0] sm:$0xff]  ;;  %v1051_v33 = vld [vmem:[#allocation2 + $0xb8] sm:$0xff] }
 0x100   : > { %v1023_v53 = vadd.f32 %v2473_v52, %v1015_v30  ;;  %1468 = vmatpush1.msra.mxu0 %v1078_v16  ;;  %v1019_v38 = vadd.f32 %v1007_v63, %v988_v27  ;;  %v1199_v63 = vld [vmem:[#allocation2 + $0x558] sm:$0xff]  ;;  %v1198_v19 = vld [vmem:[#allocation2 + $0x550] sm:$0xff] }
 0x101   : > { %v3423_v55 = vadd.f32 %v2474_v36, %v1014_v57  ;;  %1469 = vmatprep.subr.mxu0 %v1075_v61  ;;  %v1018_v0 = vadd.f32 %v1003_v21, %v987_v10  ;;  %v1054_v59 = vld [vmem:[#allocation2 + $0xd0] sm:$0xff]  ;;  %v1191_v35 = vld [vmem:[#allocation2 + $0x518] sm:$0xff] }
 0x102   : > { %1448 = vmatprep.mubr.f32.mxu1 %v1023_v53  ;;  %v3426_v12 = vadd.f32 %v2475_v15, %v1019_v38  ;;  %1470 = vmatpush1.msra.mxu0 %v1074_v44  ;;  %v1194_v47 = vld [vmem:[#allocation2 + $0x530] sm:$0xff]  ;;  %v1047_v5 = vld [vmem:[#allocation2 + $0x98] sm:$0xff] }
 0x103   : > { %1449 = vmatmul.mubr.f32.vlgmr.msra.gmra.mxu1 %v3423_v55  ;;  %1471 = vmatprep.subr.mxu0 %v1071_v56  ;;  %v3431_v25 = vadd.f32 %v2476_v45, %v1018_v0  ;;  %v1050_v29 = vld [vmem:[#allocation2 + $0xb0] sm:$0xff]  ;;  %v1187_v18 = vld [vmem:[#allocation2 + $0x4f8] sm:$0xff] }
 0x104   : > { %1539 = vmatpush1.msra.mxu1 %v1218_v43  ;;  %1454 = vmatprep.mubr.f32.mxu1 %v3426_v12  ;;  %v1190_v21 = vld [vmem:[#allocation2 + $0x510] sm:$0xff]  ;;  %v1043_v24 = vld [vmem:[#allocation2 + $0x78] sm:$0xff] }
 0x105   : > { %1540 = vmatprep.subr.mxu1 %v1215_v11  ;;  %1472 = vmatpush1.msra.mxu0 %v1070_v46  ;;  %v1046_v37 = vld [vmem:[#allocation2 + $0x90] sm:$0xff]  ;;  %v1183_v28 = vld [vmem:[#allocation2 + $0x4d8] sm:$0xff] }
 0x106   : > { %1541 = vmatpush1.msra.mxu1 %v1214_v22  ;;  %1473 = vmatprep.subr.mxu0 %v1067_v41  ;;  %v1186_v3 = vld [vmem:[#allocation2 + $0x4f0] sm:$0xff]  ;;  %v1039_v9 = vld [vmem:[#allocation2 + $0x58] sm:$0xff] }
 0x107   : > { %1542 = vmatprep.subr.mxu1 %v1211_v60  ;;  %1455 = vmatmul.mubr.f32.gmra.mxu1 %v3431_v25  ;;  %v1042_v6 = vld [vmem:[#allocation2 + $0x70] sm:$0xff]  ;;  %v1179_v2 = vld [vmem:[#allocation2 + $0x4b8] sm:$0xff] }
 0x108   : > { %1543 = vmatpush1.msra.mxu1 %v1210_v62  ;;  %1602 = vmatprep.mubr.f32.mxu1 %v1023_v53  ;;  %v1182_v7 = vld [vmem:[#allocation2 + $0x4d0] sm:$0xff]  ;;  %v1035_v58 = vld [vmem:[#allocation2 + $0x38] sm:$0xff] }
 0x109   : > { %1544 = vmatprep.subr.mxu1 %v1207_v13  ;;  %1474 = vmatpush1.msra.mxu0 %v1066_v20  ;;  %v1038_v4 = vld [vmem:[#allocation2 + $0x50] sm:$0xff]  ;;  %v1175_v30 = vld [vmem:[#allocation2 + $0x498] sm:$0xff] }
 0x10a   : > { %1545 = vmatpush1.msra.mxu1 %v1206_v54  ;;  %1475 = vmatprep.subr.mxu0 %v1063_v8  ;;  %v1178_v16 = vld [vmem:[#allocation2 + $0x4b0] sm:$0xff]  ;;  %v1031_v57 = vld [vmem:[#allocation2 + $0x18] sm:$0xff] }
 0x10b   : > { %1546 = vmatprep.subr.mxu1 %v1203_v26  ;;  %1476 = vmatpush1.msra.mxu0 %v1062_v50  ;;  %v1034_v27 = vld [vmem:[#allocation2 + $0x30] sm:$0xff]  ;;  %v1171_v44 = vld [vmem:[#allocation2 + $0x478] sm:$0xff] }
 0x10c   : > { %1547 = vmatpush1.msra.mxu1 %v1202_v51  ;;  %1477 = vmatprep.subr.mxu0 %v1059_v39  ;;  %v1174_v61 = vld [vmem:[#allocation2 + $0x490] sm:$0xff]  ;;  %v1155_v53 = vld [vmem:[#allocation2 + $0x3f8] sm:$0xff] }
 0x10d   : > { %1548 = vmatprep.subr.mxu1 %v1199_v63  ;;  %1478 = vmatpush1.msra.mxu0 %v1058_v34  ;;  %v1030_v10 = vld [vmem:[#allocation2 + $0x10] sm:$0xff]  ;;  %v1167_v38 = vld [vmem:[#allocation2 + $0x458] sm:$0xff] }
 0x10e   : > { %1549 = vmatpush1.msra.mxu1 %v1198_v19  ;;  %1479 = vmatprep.subr.mxu0 %v1055_v40  ;;  %v1170_v52 = vld [vmem:[#allocation2 + $0x470] sm:$0xff]  ;;  %v1151_v43 = vld [vmem:[#allocation2 + $0x3d8] sm:$0xff] }
 0x10f   : > { %1550 = vmatprep.subr.mxu1 %v1195_v17  ;;  %1480 = vmatpush1.msra.mxu0 %v1054_v59  ;;  %v1154_v56 = vld [vmem:[#allocation2 + $0x3f0] sm:$0xff]  ;;  %v1163_v0 = vld [vmem:[#allocation2 + $0x438] sm:$0xff] }
 0x110   : > { %1551 = vmatpush1.msra.mxu1 %v1194_v47  ;;  %1481 = vmatprep.subr.mxu0 %v1051_v33  ;;  %v1166_v36 = vld [vmem:[#allocation2 + $0x450] sm:$0xff]  ;;  %v1147_v46 = vld [vmem:[#allocation2 + $0x3b8] sm:$0xff] }
 0x111   : > { %1552 = vmatprep.subr.mxu1 %v1191_v35  ;;  %1482 = vmatpush1.msra.mxu0 %v1050_v29  ;;  %v1150_v15 = vld [vmem:[#allocation2 + $0x3d0] sm:$0xff]  ;;  %v1159_v22 = vld [vmem:[#allocation2 + $0x418] sm:$0xff] }
 0x112   : > { %1553 = vmatpush1.msra.mxu1 %v1190_v21  ;;  %1483 = vmatprep.subr.mxu0 %v1047_v5  ;;  %v1162_v11 = vld [vmem:[#allocation2 + $0x430] sm:$0xff]  ;;  %v1143_v45 = vld [vmem:[#allocation2 + $0x398] sm:$0xff] }
 0x113   : > { %1554 = vmatprep.subr.mxu1 %v1187_v18  ;;  %1484 = vmatpush1.msra.mxu0 %v1046_v37  ;;  %v1146_v41 = vld [vmem:[#allocation2 + $0x3b0] sm:$0xff]  ;;  %v1283_v62 = vld [vmem:[#allocation2 + $0x7f8] sm:$0xff] }
 0x114   : > { %1555 = vmatpush1.msra.mxu1 %v1186_v3  ;;  %1485 = vmatprep.subr.mxu0 %v1043_v24  ;;  %v1158_v60 = vld [vmem:[#allocation2 + $0x410] sm:$0xff]  ;;  %v1139_v54 = vld [vmem:[#allocation2 + $0x378] sm:$0xff] }
 0x115   : > { %1556 = vmatprep.subr.mxu1 %v1183_v28  ;;  %1486 = vmatpush1.msra.mxu0 %v1042_v6  ;;  %v1142_v13 = vld [vmem:[#allocation2 + $0x390] sm:$0xff]  ;;  %v1279_v8 = vld [vmem:[#allocation2 + $0x7d8] sm:$0xff] }
 0x116   : > { %1557 = vmatpush1.msra.mxu1 %v1182_v7  ;;  %1487 = vmatprep.subr.mxu0 %v1039_v9  ;;  %v1282_v20 = vld [vmem:[#allocation2 + $0x7f0] sm:$0xff]  ;;  %v1135_v51 = vld [vmem:[#allocation2 + $0x358] sm:$0xff] }
 0x117   : > { %1558 = vmatprep.subr.mxu1 %v1179_v2  ;;  %1488 = vmatpush1.msra.mxu0 %v1038_v4  ;;  %v1138_v26 = vld [vmem:[#allocation2 + $0x370] sm:$0xff]  ;;  %v1275_v39 = vld [vmem:[#allocation2 + $0x7b8] sm:$0xff] }
 0x118   : > { %1559 = vmatpush1.msra.mxu1 %v1178_v16  ;;  %1489 = vmatprep.subr.mxu0 %v1035_v58  ;;  %v1278_v50 = vld [vmem:[#allocation2 + $0x7d0] sm:$0xff]  ;;  %v1131_v19 = vld [vmem:[#allocation2 + $0x338] sm:$0xff] }
 0x119   : > { %1560 = vmatprep.subr.mxu1 %v1175_v30  ;;  %1490 = vmatpush1.msra.mxu0 %v1034_v27  ;;  %v1134_v63 = vld [vmem:[#allocation2 + $0x350] sm:$0xff]  ;;  %v1271_v40 = vld [vmem:[#allocation2 + $0x798] sm:$0xff] }
 0x11a   : > { %1561 = vmatpush1.msra.mxu1 %v1174_v61  ;;  %1491 = vmatprep.subr.mxu0 %v1031_v57  ;;  %v1274_v34 = vld [vmem:[#allocation2 + $0x7b0] sm:$0xff]  ;;  %v1127_v47 = vld [vmem:[#allocation2 + $0x318] sm:$0xff] }
 0x11b   : > { %1562 = vmatprep.subr.mxu1 %v1171_v44  ;;  %1492 = vmatpush1.msra.mxu0 %v1030_v10  ;;  %v1130_v17 = vld [vmem:[#allocation2 + $0x330] sm:$0xff]  ;;  %v1267_v33 = vld [vmem:[#allocation2 + $0x778] sm:$0xff] }
 0x11c   : > { %1563 = vmatpush1.msra.mxu1 %v1170_v52  ;;  %1493 = vmatprep.subr.mxu0 %v1155_v53  ;;  %v1270_v59 = vld [vmem:[#allocation2 + $0x790] sm:$0xff]  ;;  %v1123_v21 = vld [vmem:[#allocation2 + $0x2f8] sm:$0xff] }
 0x11d   : > { %1564 = vmatprep.subr.mxu1 %v1167_v38  ;;  %1494 = vmatpush2.msra.mxu0 %v1154_v56  ;;  %v1126_v35 = vld [vmem:[#allocation2 + $0x310] sm:$0xff]  ;;  %v1263_v5 = vld [vmem:[#allocation2 + $0x758] sm:$0xff] }
 0x11e   : > { %1565 = vmatpush1.msra.mxu1 %v1166_v36  ;;  %1495 = vmatprep.subr.mxu0 %v1151_v43  ;;  %v1266_v29 = vld [vmem:[#allocation2 + $0x770] sm:$0xff]  ;;  %v1119_v3 = vld [vmem:[#allocation2 + $0x2d8] sm:$0xff] }
 0x11f   : > { %1566 = vmatprep.subr.mxu1 %v1163_v0  ;;  %1496 = vmatpush2.msra.mxu0 %v1150_v15  ;;  %v1122_v18 = vld [vmem:[#allocation2 + $0x2f0] sm:$0xff]  ;;  %v1259_v24 = vld [vmem:[#allocation2 + $0x738] sm:$0xff] }
 0x120   : > { %1567 = vmatpush1.msra.mxu1 %v1162_v11  ;;  %1497 = vmatprep.subr.mxu0 %v1147_v46  ;;  %v1262_v37 = vld [vmem:[#allocation2 + $0x750] sm:$0xff]  ;;  %v1115_v7 = vld [vmem:[#allocation2 + $0x2b8] sm:$0xff] }
 0x121   : > { %1568 = vmatprep.subr.mxu1 %v1159_v22  ;;  %1498 = vmatpush2.msra.mxu0 %v1146_v41  ;;  %v1118_v28 = vld [vmem:[#allocation2 + $0x2d0] sm:$0xff]  ;;  %v1255_v9 = vld [vmem:[#allocation2 + $0x718] sm:$0xff] }
 0x122   : > { %1569 = vmatpush1.msra.mxu1 %v1158_v60  ;;  %1499 = vmatprep.subr.mxu0 %v1143_v45  ;;  %v1258_v6 = vld [vmem:[#allocation2 + $0x730] sm:$0xff]  ;;  %v1111_v16 = vld [vmem:[#allocation2 + $0x298] sm:$0xff] }
 0x123   : > { %1570 = vmatprep.subr.mxu1 %v1283_v62  ;;  %1500 = vmatpush2.msra.mxu0 %v1142_v13  ;;  %v1114_v2 = vld [vmem:[#allocation2 + $0x2b0] sm:$0xff]  ;;  %v1251_v58 = vld [vmem:[#allocation2 + $0x6f8] sm:$0xff] }
 0x124   : > { %1571 = vmatpush2.msra.mxu1 %v1282_v20  ;;  %1501 = vmatprep.subr.mxu0 %v1139_v54  ;;  %v1254_v4 = vld [vmem:[#allocation2 + $0x710] sm:$0xff]  ;;  %v1107_v61 = vld [vmem:[#allocation2 + $0x278] sm:$0xff] }
 0x125   : > { %1572 = vmatprep.subr.mxu1 %v1279_v8  ;;  %1502 = vmatpush2.msra.mxu0 %v1138_v26  ;;  %v1110_v30 = vld [vmem:[#allocation2 + $0x290] sm:$0xff]  ;;  %v1247_v57 = vld [vmem:[#allocation2 + $0x6d8] sm:$0xff]  ;;  %v1743_v8 = vld [vmem:[%s3721_s3 + $0xe0] sm:$0xff] }
 0x126   : > { %1573 = vmatpush2.msra.mxu1 %v1278_v50  ;;  %1503 = vmatprep.subr.mxu0 %v1135_v51  ;;  %v1250_v27 = vld [vmem:[#allocation2 + $0x6f0] sm:$0xff]  ;;  %v1103_v52 = vld [vmem:[#allocation2 + $0x258] sm:$0xff]  ;;  %v1727_v26 = vld [vmem:[%s3721_s3 + $0x60] sm:$0xff] }
 0x127   : > { %1574 = vmatprep.subr.mxu1 %v1275_v39  ;;  %1504 = vmatpush2.msra.mxu0 %v1134_v63  ;;  %v1106_v44 = vld [vmem:[#allocation2 + $0x270] sm:$0xff]  ;;  %v1243_v53 = vld [vmem:[#allocation2 + $0x6b8] sm:$0xff] }
 0x128   : > { %1575 = vmatpush2.msra.mxu1 %v1274_v34  ;;  %1505 = vmatprep.subr.mxu0 %v1131_v19  ;;  %v1246_v10 = vld [vmem:[#allocation2 + $0x6d0] sm:$0xff]  ;;  %v1099_v36 = vld [vmem:[#allocation2 + $0x238] sm:$0xff]  ;;  %v1740_v34 = vld [vmem:[%s3721_s3 + $0xc8] sm:$0xff] }
 0x129   : > { %1576 = vmatprep.subr.mxu1 %v1271_v40  ;;  %1506 = vmatpush2.msra.mxu0 %v1130_v17  ;;  %v1102_v38 = vld [vmem:[#allocation2 + $0x250] sm:$0xff]  ;;  %v1239_v43 = vld [vmem:[#allocation2 + $0x698] sm:$0xff]  ;;  %v1724_v19 = vld [vmem:[%s3721_s3 + $0x48] sm:$0xff] }
 0x12a   : > { %1577 = vmatpush2.msra.mxu1 %v1270_v59  ;;  %1507 = vmatprep.subr.mxu0 %v1127_v47  ;;  %v1242_v56 = vld [vmem:[#allocation2 + $0x6b0] sm:$0xff]  ;;  %v1095_v11 = vld [vmem:[#allocation2 + $0x218] sm:$0xff]  ;;  %v1739_v40 = vld [vmem:[%s3721_s3 + $0xc0] sm:$0xff] }
 0x12b   : > { %1578 = vmatprep.subr.mxu1 %v1267_v33  ;;  %1508 = vmatpush2.msra.mxu0 %v1126_v35  ;;  %v1098_v0 = vld [vmem:[#allocation2 + $0x230] sm:$0xff]  ;;  %v1235_v46 = vld [vmem:[#allocation2 + $0x678] sm:$0xff]  ;;  %v1723_v17 = vld [vmem:[%s3721_s3 + $0x40] sm:$0xff] }
 0x12c   : > { %1579 = vmatpush2.msra.mxu1 %v1266_v29  ;;  %1509 = vmatprep.subr.mxu0 %v1123_v21  ;;  %v1238_v15 = vld [vmem:[#allocation2 + $0x690] sm:$0xff]  ;;  %v1231_v60 = vld [vmem:[#allocation2 + $0x658] sm:$0xff]  ;;  %v1736_v29 = vld [vmem:[%s3721_s3 + $0xa8] sm:$0xff] }
 0x12d   : > { %1580 = vmatprep.subr.mxu1 %v1263_v5  ;;  %1510 = vmatpush2.msra.mxu0 %v1122_v18  ;;  %v1094_v22 = vld [vmem:[#allocation2 + $0x210] sm:$0xff]  ;;  %v1227_v62 = vld [vmem:[#allocation2 + $0x638] sm:$0xff]  ;;  %v1720_v21 = vld [vmem:[%s3721_s3 + $0x28] sm:$0xff] }
 0x12e   : > { %1581 = vmatpush2.msra.mxu1 %v1262_v37  ;;  %1511 = vmatprep.subr.mxu0 %v1119_v3  ;;  %v1234_v41 = vld [vmem:[#allocation2 + $0x670] sm:$0xff]  ;;  %v1223_v20 = vld [vmem:[#allocation2 + $0x618] sm:$0xff]  ;;  %v1735_v5 = vld [vmem:[%s3721_s3 + $0xa0] sm:$0xff] }
 0x12f   : > { %1582 = vmatprep.subr.mxu1 %v1259_v24  ;;  %1512 = vmatpush2.msra.mxu0 %v1118_v28  ;;  %v1230_v45 = vld [vmem:[#allocation2 + $0x650] sm:$0xff]  ;;  %v1742_v50 = vld [vmem:[%s3721_s3 + $0xd8] sm:$0xff]  ;;  %v1719_v18 = vld [vmem:[%s3721_s3 + $0x20] sm:$0xff] }
 0x130   : > { %1583 = vmatpush2.msra.mxu1 %v1258_v6  ;;  %1513 = vmatprep.subr.mxu0 %v1115_v7  ;;  %v1226_v13 = vld [vmem:[#allocation2 + $0x630] sm:$0xff]  ;;  %v1726_v51 = vld [vmem:[%s3721_s3 + $0x58] sm:$0xff]  ;;  %v1732_v6 = vld [vmem:[%s3721_s3 + $0x88] sm:$0xff] }
 0x131   : > { %1584 = vmatprep.subr.mxu1 %v1255_v9  ;;  %1514 = vmatpush2.msra.mxu0 %v1114_v2  ;;  %v1222_v54 = vld [vmem:[#allocation2 + $0x610] sm:$0xff]  ;;  %v1738_v59 = vld [vmem:[%s3721_s3 + $0xb8] sm:$0xff]  ;;  %v1716_v7 = vld [vmem:[%s3721_s3 + $0x8] sm:$0xff] }
 0x132   : > { %1585 = vmatpush2.msra.mxu1 %v1254_v4  ;;  %1515 = vmatprep.subr.mxu0 %v1111_v16  ;;  %v1741_v39 = vld [vmem:[%s3721_s3 + $0xd0] sm:$0xff]  ;;  %v1722_v47 = vld [vmem:[%s3721_s3 + $0x38] sm:$0xff]  ;;  %v1731_v9 = vld [vmem:[%s3721_s3 + $0x80] sm:$0xff] }
 0x133   : > { %1586 = vmatprep.subr.mxu1 %v1251_v58  ;;  %1516 = vmatpush2.msra.mxu0 %v1110_v30  ;;  %v1725_v63 = vld [vmem:[%s3721_s3 + $0x50] sm:$0xff]  ;;  %v1734_v37 = vld [vmem:[%s3721_s3 + $0x98] sm:$0xff]  ;;  %v1715_v2 = vld [vmem:[%s3721_s3] sm:$0xff] }
 0x134   : > { %1587 = vmatpush2.msra.mxu1 %v1250_v27  ;;  %1517 = vmatprep.subr.mxu0 %v1107_v61  ;;  %v1737_v33 = vld [vmem:[%s3721_s3 + $0xb0] sm:$0xff]  ;;  %v1718_v3 = vld [vmem:[%s3721_s3 + $0x18] sm:$0xff]  ;;  %v1776_v27 = vld [vmem:[%s3721_s3 + $0x1e8] sm:$0xff] }
 0x135   : > { %1588 = vmatprep.subr.mxu1 %v1247_v57  ;;  %1518 = vmatpush2.msra.mxu0 %v1106_v44  ;;  %v1721_v35 = vld [vmem:[%s3721_s3 + $0x30] sm:$0xff]  ;;  %v1778_v4 = vld [vmem:[%s3721_s3 + $0x1f8] sm:$0xff]  ;;  %v1760_v61 = vld [vmem:[%s3721_s3 + $0x168] sm:$0xff] }
 0x136   : > { %1589 = vmatpush2.msra.mxu1 %v1246_v10  ;;  %1519 = vmatprep.subr.mxu0 %v1103_v52  ;;  %v1733_v24 = vld [vmem:[%s3721_s3 + $0x90] sm:$0xff]  ;;  %v1762_v16 = vld [vmem:[%s3721_s3 + $0x178] sm:$0xff]  ;;  %v1775_v57 = vld [vmem:[%s3721_s3 + $0x1e0] sm:$0xff] }
 0x137   : > { %1590 = vmatprep.subr.mxu1 %v1243_v53  ;;  %1520 = vmatpush2.msra.mxu0 %v1102_v38  ;;  %v1717_v28 = vld [vmem:[%s3721_s3 + $0x10] sm:$0xff]  ;;  %v1759_v44 = vld [vmem:[%s3721_s3 + $0x160] sm:$0xff]  ;;  %v1774_v10 = vld [vmem:[%s3721_s3 + $0x1d8] sm:$0xff] }
 0x138   : > { %1591 = vmatpush2.msra.mxu1 %v1242_v56  ;;  %1521 = vmatprep.subr.mxu0 %v1099_v36  ;;  %v1777_v58 = vld [vmem:[%s3721_s3 + $0x1f0] sm:$0xff]  ;;  %v1758_v52 = vld [vmem:[%s3721_s3 + $0x158] sm:$0xff]  ;;  %v1772_v56 = vld [vmem:[%s3721_s3 + $0x1c8] sm:$0xff] }
 0x139   : > { %1592 = vmatprep.subr.mxu1 %v1239_v43  ;;  %1522 = vmatpush2.msra.mxu0 %v1098_v0  ;;  %v1761_v30 = vld [vmem:[%s3721_s3 + $0x170] sm:$0xff]  ;;  %v1756_v36 = vld [vmem:[%s3721_s3 + $0x148] sm:$0xff]  ;;  %v1771_v43 = vld [vmem:[%s3721_s3 + $0x1c0] sm:$0xff] }
 0x13a   : > { %1593 = vmatpush2.msra.mxu1 %v1238_v15  ;;  %1523 = vmatprep.subr.mxu0 %v1095_v11  ;;  %v1773_v53 = vld [vmem:[%s3721_s3 + $0x1d0] sm:$0xff]  ;;  %v1755_v0 = vld [vmem:[%s3721_s3 + $0x140] sm:$0xff]  ;;  %v1770_v15 = vld [vmem:[%s3721_s3 + $0x1b8] sm:$0xff] }
 0x13b   : > { %1594 = vmatprep.subr.mxu1 %v1235_v46  ;;  %1524 = vmatpush2.msra.mxu0 %v1094_v22  ;;  %v1757_v38 = vld [vmem:[%s3721_s3 + $0x150] sm:$0xff]  ;;  %v1754_v11 = vld [vmem:[%s3721_s3 + $0x138] sm:$0xff] }
 0x13c   : > { %1595 = vmatpush2.msra.mxu1 %v1234_v41  ;;  %1526 = vmatmul.mubr.f32.vlgmr.msra.gmra.mxu0 %v3402_v48  ;;  %v1746_v48 = vld [vmem:[%s3721_s3 + $0xf8] sm:$0xff]  ;;  %v1769_v46 = vld [vmem:[%s3721_s3 + $0x1b0] sm:$0xff]  ;;  %v1768_v41 = vld [vmem:[%s3721_s3 + $0x1a8] sm:$0xff] }
 0x13d   : > { %1596 = vmatprep.subr.mxu1 %v1231_v60  ;;  %1531 = vmatprep.mubr.f32.mxu0 %v3406_v42  ;;  %v1730_v42 = vld [vmem:[%s3721_s3 + $0x78] sm:$0xff]  ;;  %v1753_v22 = vld [vmem:[%s3721_s3 + $0x130] sm:$0xff]  ;;  %v1752_v60 = vld [vmem:[%s3721_s3 + $0x128] sm:$0xff] }
 0x13e   : > { %1597 = vmatpush2.msra.mxu1 %v1230_v45  ;;  %2285 = vmatprep.subr.mxu0 %v1746_v48  ;;  %v1767_v45 = vld [vmem:[%s3721_s3 + $0x1a0] sm:$0xff]  ;;  %v1749_v48 = vld [vmem:[%s3721_s3 + $0x110] sm:$0xff] }
 0x13f   : > { %1598 = vmatprep.subr.mxu1 %v1227_v62  ;;  %2286 = vmatpush3.msra.mxu0 %v1730_v42  ;;  %v1751_v62 = vld [vmem:[%s3721_s3 + $0x120] sm:$0xff]  ;;  %v1764_v42 = vld [vmem:[%s3721_s3 + $0x188] sm:$0xff] }
 0x140   : > { %1599 = vmatpush2.msra.mxu1 %v1226_v13  ;;  %1532 = vmatmul.mubr.f32.gmra.mxu0 %v3417_v32  ;;  %v1745_v32 = vld [vmem:[%s3721_s3 + $0xf0] sm:$0xff]  ;;  %v1766_v13 = vld [vmem:[%s3721_s3 + $0x198] sm:$0xff] }
 0x141   : > { %1600 = vmatprep.subr.mxu1 %v1223_v20  ;;  %2287 = vmatprep.subr.mxu0 %v1745_v32  ;;  %v1750_v20 = vld [vmem:[%s3721_s3 + $0x118] sm:$0xff]  ;;  %v1748_v32 = vld [vmem:[%s3721_s3 + $0x108] sm:$0xff] }
 0x142   : > { %1601 = vmatpush2.msra.mxu1 %v1222_v54  ;;  %v1765_v54 = vld [vmem:[%s3721_s3 + $0x190] sm:$0xff] }
 0x143   : > { %1603 = vmatmul.mubr.f32.vlgmr.msra.gmra.mxu1 %v3423_v55  ;;  %v1729_v55 = vld [vmem:[%s3721_s3 + $0x70] sm:$0xff]  ;;  %2320 = vmatprep.subr.mxu1 %v1778_v4 }
 0x144   : > { %1608 = vmatprep.mubr.f32.mxu1 %v3426_v12  ;;  %2288 = vmatpush3.msra.mxu0 %v1729_v55  ;;  %v1744_v12 = vld [vmem:[%s3721_s3 + $0xe8] sm:$0xff]  ;;  %v1763_v55 = vld [vmem:[%s3721_s3 + $0x180] sm:$0xff] }
 0x145   : > { %2289 = vmatprep.subr.mxu0 %v1744_v12  ;;  %2321 = vmatpush3.msra.mxu1 %v1762_v16 }
 0x146   : > { %2322 = vmatprep.subr.mxu1 %v1777_v58 }
 0x147   : > { %1609 = vmatmul.mubr.f32.gmra.mxu1 %v3431_v25  ;;  %v1728_v25 = vld [vmem:[%s3721_s3 + $0x68] sm:$0xff] }
 0x148   : > { %2290 = vmatpush3.msra.mxu0 %v1728_v25  ;;  %2323 = vmatpush3.msra.mxu1 %v1761_v30  ;;  %v1747_v25 = vld [vmem:[%s3721_s3 + $0x100] sm:$0xff] }
 0x149   : > { %2291 = vmatprep.subr.mxu0 %v1743_v8  ;;  %2324 = vmatprep.subr.mxu1 %v1776_v27  ;;  %v3635_v8 = vld [vmem:[%s3719_s1 + $0x24] ss:$8 sm:$0xf] }
 0x14a   : > { %2292 = vmatpush3.msra.mxu0 %v1727_v26  ;;  %2325 = vmatpush3.msra.mxu1 %v1760_v61  ;;  %v1290_v26 = vrot.slane %v3635_v8, %v3797_v49 }
 0x14b   : > { %2293 = vmatprep.subr.mxu0 %v1742_v50  ;;  %2326 = vmatprep.subr.mxu1 %v1775_v57 }
 0x14c   : > { %2294 = vmatpush3.msra.mxu0 %v1726_v51  ;;  %2327 = vmatpush3.msra.mxu1 %v1759_v44  ;;  %v1294_v51 = vrot.slane %v3635_v8, %v3796_v31 }
 0x14d   : > { %2295 = vmatprep.subr.mxu0 %v1741_v39  ;;  %2328 = vmatprep.subr.mxu1 %v1774_v10 }
 0x14e   : > { %2296 = vmatpush3.msra.mxu0 %v1725_v63  ;;  %2329 = vmatpush3.msra.mxu1 %v1758_v52 }
 0x14f   : > { %2297 = vmatprep.subr.mxu0 %v1740_v34  ;;  %2330 = vmatprep.subr.mxu1 %v1773_v53 }
 0x150   : > { %2298 = vmatpush3.msra.mxu0 %v1724_v19  ;;  %2331 = vmatpush3.msra.mxu1 %v1757_v38 }
 0x151   : > { %2299 = vmatprep.subr.mxu0 %v1739_v40  ;;  %2332 = vmatprep.subr.mxu1 %v1772_v56 }
 0x152   : > { %2300 = vmatpush3.msra.mxu0 %v1723_v17  ;;  %2333 = vmatpush3.msra.mxu1 %v1756_v36 }
 0x153   : > { %2301 = vmatprep.subr.mxu0 %v1738_v59  ;;  %2334 = vmatprep.subr.mxu1 %v1771_v43 }
 0x154   : > { %2302 = vmatpush3.msra.mxu0 %v1722_v47  ;;  %2335 = vmatpush3.msra.mxu1 %v1755_v0 }
 0x155   : > { %2303 = vmatprep.subr.mxu0 %v1737_v33  ;;  %2336 = vmatprep.subr.mxu1 %v1770_v15 }
 0x156   : > { %2304 = vmatpush3.msra.mxu0 %v1721_v35  ;;  %2337 = vmatpush3.msra.mxu1 %v1754_v11 }
 0x157   : > { %2305 = vmatprep.subr.mxu0 %v1736_v29  ;;  %2338 = vmatprep.subr.mxu1 %v1769_v46 }
 0x158   : > { %2306 = vmatpush3.msra.mxu0 %v1720_v21  ;;  %2339 = vmatpush3.msra.mxu1 %v1753_v22 }
 0x159   : > { %2307 = vmatprep.subr.mxu0 %v1735_v5  ;;  %2340 = vmatprep.subr.mxu1 %v1768_v41 }
 0x15a   : > { %2308 = vmatpush3.msra.mxu0 %v1719_v18  ;;  %2341 = vmatpush3.msra.mxu1 %v1752_v60 }
 0x15b   : > { %2309 = vmatprep.subr.mxu0 %v1734_v37  ;;  %2342 = vmatprep.subr.mxu1 %v1767_v45 }
 0x15c   : > { %2310 = vmatpush3.msra.mxu0 %v1718_v3  ;;  %2343 = vmatpush3.msra.mxu1 %v1751_v62 }
 0x15d   : > { %2311 = vmatprep.subr.mxu0 %v1733_v24  ;;  %2344 = vmatprep.subr.mxu1 %v1766_v13 }
 0x15e   : > { %2312 = vmatpush3.msra.mxu0 %v1717_v28  ;;  %2345 = vmatpush3.msra.mxu1 %v1750_v20 }
 0x15f   : > { %2313 = vmatprep.subr.mxu0 %v1732_v6  ;;  %2346 = vmatprep.subr.mxu1 %v1765_v54 }
 0x160   : > { %2314 = vmatpush3.msra.mxu0 %v1716_v7  ;;  %2347 = vmatpush3.msra.mxu1 %v1749_v48 }
 0x161   : > { %2315 = vmatprep.subr.mxu0 %v1731_v9  ;;  %2348 = vmatprep.subr.mxu1 %v1764_v42 }
 0x162   : > { %2316 = vmatpush3.msra.mxu0 %v1715_v2  ;;  %2349 = vmatpush3.msra.mxu1 %v1748_v32 }
 0x163   : > { %2350 = vmatprep.subr.mxu1 %v1763_v55 }
 0x164   : > { %2351 = vmatpush3.msra.mxu1 %v1747_v25 }
 0x1b9   : > { %v1373_v12 = vpop.f32.mrf.mxu0 }
 0x1ba   : > { %v1374_v39 = vadd.f32 %v1373_v12, %v1290_v26 }
 0x1bb   : > { %v1375_v50 = vpop.f32.mrf.mxu0 }
 0x1bc   : > { %v1376_v19 = vadd.f32 %v1375_v50, %v1294_v51 }
 0x1bd   : > { %v1379_v63 = vpop.f32.mrf.mxu0 }
 0x1be   : > { %v1380_v59 = vadd.f32 %v1379_v63, %v1290_v26 }
 0x1bf   : > { %v1381_v47 = vpop.f32.mrf.mxu0 }
 0x1c0   : > { %v1382_v37 = vadd.f32 %v1381_v47, %v1294_v51 }
 0x1c3   : > { %v1450_v34 = vpop.f32.mrf.mxu1 }
 0x1c4   : > { %v1451_v40 = vadd.f32 %v1450_v34, %v1374_v39 }
 0x1c5   : > { %v1452_v17 = vpop.f32.mrf.mxu1 }
 0x1c6   : > { %v1623_v33 = vmul.f32 0.044715, %v1451_v40  ;;  %v1453_v35 = vadd.f32 %v1452_v17, %v1376_v19  ;;  %v1615_v0 = vmul.f32 0.5, %v1451_v40 }
 0x1c7   : > { %v1456_v29 = vpop.f32.mrf.mxu1 }
 0x1c8   : > { %v1631_v21 = vmul.f32 %v1623_v33, %v1451_v40  ;;  %v1624_v5 = vmul.f32 0.044715, %v1453_v35  ;;  %v1457_v18 = vadd.f32 %v1456_v29, %v1380_v59  ;;  %v1616_v45 = vmul.f32 0.5, %v1453_v35 }
 0x1c9   : > { %v1458_v3 = vpop.f32.mrf.mxu1  ;;  %v1298_v59 = vrot.slane %v3635_v8, %v3799_v1  ;;  %v1302_v33 = vrot.slane %v3635_v8, %v3798_v14 }
 0x1ca   : > { %v1639_v24 = vmul.f32 %v1631_v21, %v1451_v40  ;;  %v1632_v28 = vmul.f32 %v1624_v5, %v1453_v35  ;;  %v1627_v6 = vmul.f32 0.044715, %v1457_v18  ;;  %v1459_v31 = vadd.f32 %v1458_v3, %v1382_v37 }
 0x1cb   : > { %v1619_v15 = vmul.f32 0.5, %v1457_v18 }
 0x1cc   : > { %v1647_v7 = vadd.f32 %v1639_v24, %v1451_v40  ;;  %v1640_v9 = vmul.f32 %v1632_v28, %v1453_v35  ;;  %v1635_v2 = vmul.f32 %v1627_v6, %v1457_v18  ;;  %v1628_v4 = vmul.f32 0.044715, %v1459_v31 }
 0x1cd   : > { %v1620_v62 = vmul.f32 0.5, %v1459_v31 }
 0x1ce   : > { %v1655_v16 = vmul.f32 0.7978846, %v1647_v7  ;;  %v1648_v58 = vadd.f32 %v1640_v9, %v1453_v35  ;;  %v1643_v30 = vmul.f32 %v1635_v2, %v1457_v18  ;;  %v1636_v27 = vmul.f32 %v1628_v4, %v1459_v31 }
 0x1d0   : > { %2429 = vtanh.f32 %v1655_v16  ;;  %v1656_v61 = vmul.f32 0.7978846, %v1648_v58  ;;  %v1651_v57 = vadd.f32 %v1643_v30, %v1457_v18  ;;  %v1644_v44 = vmul.f32 %v1636_v27, %v1459_v31 }
 0x1d2   : > { %v1659_v10 = vmul.f32 0.7978846, %v1651_v57  ;;  %2431 = vtanh.f32 %v1656_v61  ;;  %v1652_v52 = vadd.f32 %v1644_v44, %v1459_v31 }
 0x1d4   : > { %2433 = vtanh.f32 %v1659_v10  ;;  %v1660_v53 = vmul.f32 0.7978846, %v1652_v52 }
 0x1d6   : > { %2435 = vtanh.f32 %v1660_v53 }
 0x1dd   : > { %v2430_v38 = vpop.eup %2429 }
 0x1de   : > { %v1671_v36 = vadd.f32 1.0, %v2430_v38 }
 0x1df   : > { %v2432_v56 = vpop.eup %2431 }
 0x1e0   : > { %v1672_v46 = vadd.f32 1.0, %v2432_v56  ;;  %v1679_v41 = vmul.f32 %v1671_v36, %v1615_v0 }
 0x1e1   : > { %v2434_v43 = vpop.eup %2433 }
 0x1e2   : > { %v1675_v11 = vadd.f32 1.0, %v2434_v43  ;;  %v1680_v54 = vmul.f32 %v1672_v46, %v1616_v45 }
 0x1e3   : > { %v2436_v22 = vpop.eup %2435 }
 0x1e4   : > { %v1683_v60 = vmul.f32 %v1675_v11, %v1619_v15  ;;  %v1676_v13 = vadd.f32 1.0, %v2436_v22 }
 0x1e6   : > { %v1687_v20 = vadd.f32 %v1683_v60, %v1679_v41  ;;  %v1684_v48 = vmul.f32 %v1676_v13, %v1620_v62 }
 0x1e8   : > { %v1688_v42 = vrot.slane %v1687_v20, 4  ;;  %v1694_v32 = vadd.f32 %v1684_v48, %v1680_v54 }
 0x1ea   : > { %v1689_v55 = vadd.f32 %v1688_v42, %v1687_v20  ;;  %v1695_v12 = vrot.slane %v1694_v32, 4 }
 0x1ec   : > { %v1690_v25 = vrot.slane %v1689_v55, 2  ;;  %v1696_v26 = vadd.f32 %v1695_v12, %v1694_v32 }
 0x1ee   : > { %v1691_v50 = vadd.f32 %v1690_v25, %v1689_v55  ;;  %v1697_v51 = vrot.slane %v1696_v26, 2 }
 0x1f0   : > { %v1698_v39 = vadd.f32 %v1697_v51, %v1696_v26  ;;  %v1692_v63 = vrot.slane %v1691_v50, 1 }
 0x1f2   : > { %v1699_v34 = vrot.slane %v1698_v39, 1  ;;  %v1693_v40 = vadd.f32 %v1692_v63, %v1691_v50 }
 0x1f4   : > { %v1700_v19 = vadd.f32 %v1699_v34, %v1698_v39 }
 0x1f6   : > { %1844 = vmatprep.mubr.f32.mxu0 %v1700_v19 }
 0x1f7   : > { %1845 = vmatmul.mubr.f32.vlgmr.msra.gmra.mxu0 %v1693_v40 }
 0x1fc   : > { %v1527_v17 = vpop.f32.mrf.mxu0 }
 0x1fd   : > { %v1528_v35 = vadd.f32 %v1527_v17, %v1298_v59 }
 0x1fe   : > { %v1529_v47 = vpop.f32.mrf.mxu0 }
 0x1ff   : > { %v1530_v5 = vadd.f32 %v1529_v47, %v1302_v33 }
 0x200   : > { %v1533_v29 = vpop.f32.mrf.mxu0 }
 0x201   : > { %v1534_v3 = vadd.f32 %v1533_v29, %v1298_v59 }
 0x202   : > { %v1535_v24 = vpop.f32.mrf.mxu0 }
 0x203   : > { %v1604_v21 = vpop.f32.mrf.mxu1  ;;  %v1536_v4 = vadd.f32 %v1535_v24, %v1302_v33 }
 0x204   : > { %v1605_v18 = vadd.f32 %v1604_v21, %v1528_v35  ;;  %v2582_v21 = vmov 1983009808  }
 0x205   : > { %v1606_v37 = vpop.f32.mrf.mxu1 }
 0x206   : > { %v1625_v28 = vmul.f32 0.044715, %v1605_v18  ;;  %v1607_v6 = vadd.f32 %v1606_v37, %v1530_v5  ;;  %v1617_v60 = vmul.f32 0.5, %v1605_v18  ;;  %v1925_v5 = vunpack.c.l.s4 %v2582_v21  ;;  %v1921_v37 = vld [vmem:[%s3723_s5] sm:$0xff]  ;;  %v2482_v21 = vld [vmem:[%s2692_s26 + $0x28] sm:$0xff] }
 0x207   : > { %v1610_v31 = vpop.f32.mrf.mxu1  ;;  %v1923_v24 = vcombine.high %v1921_v37, %v1921_v37 }
 0x208   : > { %v1633_v7 = vmul.f32 %v1625_v28, %v1605_v18  ;;  %v1626_v9 = vmul.f32 0.044715, %v1607_v6  ;;  %v1611_v2 = vadd.f32 %v1610_v31, %v1534_v3  ;;  %v1618_v42 = vmul.f32 0.5, %v1607_v6 }
 0x209   : > { %v1612_v1 = vpop.f32.mrf.mxu1  ;;  %v2583_v28 = vmov 0.0  }
 0x20a   : > { %v1641_v16 = vmul.f32 %v1633_v7, %v1605_v18  ;;  %v1634_v58 = vmul.f32 %v1626_v9, %v1607_v6  ;;  %v1629_v30 = vmul.f32 0.044715, %v1611_v2  ;;  %v1613_v14 = vadd.f32 %v1612_v1, %v1536_v4  ;;  %2017 = vmatprep.mubr.f32.mxu0 %v2583_v28 }
 0x20b   : > { %v1621_v45 = vmul.f32 0.5, %v1611_v2 }
 0x20c   : > { %v1649_v8 = vadd.f32 %v1641_v16, %v1605_v18  ;;  %v1642_v27 = vmul.f32 %v1634_v58, %v1607_v6  ;;  %v1637_v61 = vmul.f32 %v1629_v30, %v1611_v2  ;;  %v1630_v57 = vmul.f32 0.044715, %v1613_v14 }
 0x20d   : > { %v1622_v32 = vmul.f32 0.5, %v1613_v14  ;;  %v1926_v18 = vunpack.c.0.s8 %v1925_v5 }
 0x20e   : > { %v1657_v44 = vmul.f32 0.7978846, %v1649_v8  ;;  %v1650_v10 = vadd.f32 %v1642_v27, %v1607_v6  ;;  %v1645_v52 = vmul.f32 %v1637_v61, %v1611_v2  ;;  %v1638_v53 = vmul.f32 %v1630_v57, %v1613_v14 }
 0x20f   : > { %v1929_v3 = vsub.s32 %v1926_v18, %v2750_v23  ;;  %v1779_v23 = vld [vmem:[%s3722_s4] sm:$0x1]  ;;  %v2483_v18 = vld [vmem:[%s2692_s26 + $0x18] sm:$0xff] }
 0x210   : > { %2437 = vtanh.f32 %v1657_v44  ;;  %v1658_v38 = vmul.f32 0.7978846, %v1650_v10  ;;  %v1653_v56 = vadd.f32 %v1645_v52, %v1611_v2  ;;  %v1646_v36 = vmul.f32 %v1638_v53, %v1613_v14 }
 0x211   : > { %v1930_v6 = vrot.slane %v1921_v37, %v1929_v3  ;;  %v1937_v31 = vrot.slane %v1923_v24, %v1929_v3  ;;  %v2484_v3 = vld [vmem:[%s2692_s26 + $0x38] sm:$0xff] }
 0x212   : > { %v1661_v43 = vmul.f32 0.7978846, %v1653_v56  ;;  %2439 = vtanh.f32 %v1658_v38  ;;  %v1654_v0 = vadd.f32 %v1646_v36, %v1613_v14 }
 0x213   : > { %v1938_v7 = vcombine.high %v1930_v6, %v1930_v6  ;;  %v1939_v9 = vcombine.high %v1937_v31, %v1937_v31 }
 0x214   : > { %2441 = vtanh.f32 %v1661_v43  ;;  %v1662_v15 = vmul.f32 0.7978846, %v1654_v0 }
 0x215   : > { %2268 = vmatprep.subr.msk.mxu0 %vm1944_vm8, %v1938_v7  ;;  %2271 = vmatprep.subr.msk.mxu1 %vm1944_vm8, %v1939_v9 }
 0x216   : > { %2443 = vtanh.f32 %v1662_v15  ;;  %2269 = vmatpush1.msk.msra.mxu0 %vm1944_vm8, %v1930_v6 }
 0x21d   : > { %v2438_v11 = vpop.eup %2437 }
 0x21e   : > { %v1673_v22 = vadd.f32 1.0, %v2438_v11 }
 0x21f   : > { %v2440_v46 = vpop.eup %2439 }
 0x220   : > { %v1674_v13 = vadd.f32 1.0, %v2440_v46  ;;  %v1681_v54 = vmul.f32 %v1673_v22, %v1617_v60 }
 0x221   : > { %v2442_v41 = vpop.eup %2441 }
 0x222   : > { %v1677_v62 = vadd.f32 1.0, %v2442_v41  ;;  %v1682_v25 = vmul.f32 %v1674_v13, %v1618_v42 }
 0x223   : > { %v2444_v20 = vpop.eup %2443 }
 0x224   : > { %v1685_v48 = vmul.f32 %v1677_v62, %v1621_v45  ;;  %v1678_v55 = vadd.f32 1.0, %v2444_v20 }
 0x226   : > { %v1701_v12 = vadd.f32 %v1685_v48, %v1681_v54  ;;  %v1686_v26 = vmul.f32 %v1678_v55, %v1622_v32 }
 0x228   : > { %v1702_v50 = vrot.slane %v1701_v12, 4  ;;  %v1708_v51 = vadd.f32 %v1686_v26, %v1682_v25 }
 0x22a   : > { %v1703_v39 = vadd.f32 %v1702_v50, %v1701_v12  ;;  %v1709_v63 = vrot.slane %v1708_v51, 4 }
 0x22c   : > { %v1704_v34 = vrot.slane %v1703_v39, 2  ;;  %v1710_v19 = vadd.f32 %v1709_v63, %v1708_v51  ;;  %v2477_v51 = vld [vmem:[%s2692_s26] sm:$0xff] }
 0x22d   : > { %v2478_v63 = vld [vmem:[%s2692_s26 + $0x20] sm:$0xff] }
 0x22e   : > { %v1705_v40 = vadd.f32 %v1704_v34, %v1703_v39  ;;  %v1711_v17 = vrot.slane %v1710_v19, 2 }
 0x230   : > { %v1712_v59 = vadd.f32 %v1711_v17, %v1710_v19  ;;  %v1706_v47 = vrot.slane %v1705_v40, 1 }
 0x232   : > { %v1713_v33 = vrot.slane %v1712_v59, 1  ;;  %v1707_v29 = vadd.f32 %v1706_v47, %v1705_v40  ;;  %v2479_v40 = vld [vmem:[%s2692_s26 + $0x10] sm:$0xff] }
 0x234   : > { %v1714_v35 = vadd.f32 %v1713_v33, %v1712_v59  ;;  %v2480_v59 = vld [vmem:[%s2692_s26 + $0x30] sm:$0xff] }
 0x236   : > { %1914 = vmatprep.mubr.f32.mxu1 %v1714_v35  ;;  %v2481_v35 = vld [vmem:[%s2692_s26 + $0x8] sm:$0xff]  ;;  %s2515_s26 = sshll.u32 %s2584_s20, 4  ;;  %s2516_s26 = int_to_ptr.vmem [resolvable:$false] %s2515_s26 }
 0x237   : > { %1915 = vmatmul.mubr.f32.vlgmr.msra.gmra.mxu1 %v1707_v29  ;;  %s2517_s29 = scalar_lea.vmem %s2516_s26, 2048  ;;  %p2518_p11 = scmp.lt.s32.totalorder %s3673_s15, %s2516_s26 }
 0x238   : > { %2088 = vmatprep.mubr.f32.mxu1 %v2583_v28  ;;  %2272 = vmatpush1.msk.msra.mxu1 %vm1944_vm8, %v1937_v31  ;;  %p2519_p12 = scmp.lt.s32.totalorder %s2517_s29, %s2511_s19 }
 0x23a   : > { %p2520_p13 = por %p2519_p12, %p2518_p11 }
 0x23c   : > { %p2521_p0 = pnand %p2520_p13, %p2514_p10 }
 0x2b7   : > { %v2317_v2 = vpop.f32.mrf.mxu0 }
 0x2b9   : > { %v2318_v4 = vpop.f32.mrf.mxu0 }
 0x2ba   : > { %v2319_v1 = vadd.f32 %v2318_v4, %v2317_v2 }
 0x2bc   : > { %v1847_v30 = vadd.f32 %v2319_v1, %v1779_v23 }
 0x2f7   : > { %v2352_v16 = vpop.f32.mrf.mxu1 }
 0x2f9   : > { %v2353_v58 = vpop.f32.mrf.mxu1 }
 0x2fa   : > { %v2354_v14 = vadd.f32 %v2353_v58, %v2352_v16 }
 0x2fc   : > { %v1917_v8 = vadd.f32 %v2354_v14, %v1847_v30 }
 0x2fe   : > { %v1920_v27 = vmax.f32 %v1917_v8, 0.0 }
 0x300   : > { %2270 = vmatmul.mubr.msk.f32.vlgmr.msra.gmra.mxu0 %vm1940_vm9, %v1920_v27  ;;  %2273 = vmatmul.mubr.msk.f32.vlgmr.msra.gmra.mxu1 %vm1940_vm9, %v1920_v27 }
 0x3c0   : > { %v2019_v61 = vpop.f32.mrf.mxu0  ;;  %v2090_v57 = vpop.f32.mrf.mxu1 }
 0x3c1   : > { %v2274_v44 = vmul.f32 -1.442695, %v2019_v61  ;;  %v2276_v10 = vmul.f32 -1.442695, %v2090_v57 }
 0x3c2   : > { %v2021_v52 = vpop.f32.mrf.mxu0  ;;  %v2092_v53 = vpop.f32.mrf.mxu1 }
 0x3c3   : > { %2445 = vpow2.f32 %v2274_v44  ;;  %v2275_v38 = vmul.f32 -1.442695, %v2021_v52  ;;  %v2277_v56 = vmul.f32 -1.442695, %v2092_v53 }
 0x3c4   : > { %2447 = vpow2.f32 %v2276_v10 }
 0x3c5   : > { %2449 = vpow2.f32 %v2275_v38 }
 0x3c6   : > { %2451 = vpow2.f32 %v2277_v56 }
 0x3d0   : > { %v2446_v36 = vpop.eup %2445 }
 0x3d1   : > { %v2448_v43 = vpop.eup %2447  ;;  %v2107_v0 = vadd.f32 1.0, %v2446_v36 }
 0x3d2   : > { %v2450_v15 = vpop.eup %2449  ;;  %v2109_v11 = vadd.f32 1.0, %v2448_v43 }
 0x3d3   : > { %v2452_v46 = vpop.eup %2451  ;;  %2453 = vrcp.f32 %v2107_v0  ;;  %v2108_v22 = vadd.f32 1.0, %v2450_v15 }
 0x3d4   : > { %2455 = vrcp.f32 %v2109_v11  ;;  %v2110_v41 = vadd.f32 1.0, %v2452_v46 }
 0x3d5   : > { %2457 = vrcp.f32 %v2108_v22 }
 0x3d6   : > { %2459 = vrcp.f32 %v2110_v41 }
 0x3e0   : > { %v2454_v60 = vpop.eup %2453 }
 0x3e1   : > { %v2456_v45 = vpop.eup %2455  ;;  %v2119_v62 = vmul.f32 1.442695, %v2454_v60 }
 0x3e2   : > { %v2458_v13 = vpop.eup %2457  ;;  %v2123_v20 = vmul.f32 1.442695, %v2456_v45 }
 0x3e3   : > { %v2460_v54 = vpop.eup %2459  ;;  %2461 = vpow2.f32 %v2119_v62  ;;  %v2121_v48 = vmul.f32 1.442695, %v2458_v13 }
 0x3e4   : > { %2463 = vpow2.f32 %v2123_v20  ;;  %v2125_v42 = vmul.f32 1.442695, %v2460_v54 }
 0x3e5   : > { %2465 = vpow2.f32 %v2121_v48 }
 0x3e6   : > { %2467 = vpow2.f32 %v2125_v42 }
 0x3f0   : > { %v2462_v32 = vpop.eup %2461 }
 0x3f1   : > { %v2464_v55 = vpop.eup %2463  ;;  %v2130_v12 = vrot.slane %v2462_v32, %v3797_v49 }
 0x3f2   : > { %v2466_v25 = vpop.eup %2465  ;;  %v2138_v26 = vrot.slane %v2464_v55, %v3797_v49 }
 0x3f3   : > { %v2468_v50 = vpop.eup %2467  ;;  %v2143_v39 = vmul.f32 %v2477_v51, %v2130_v12  ;;  %v2147_v34 = vmul.f32 %v2478_v63, %v2130_v12  ;;  %v2134_v19 = vrot.slane %v2466_v25, %v3797_v49 }
 0x3f4   : > { %v2145_v17 = vmul.f32 %v2479_v40, %v2138_v26  ;;  %v2149_v47 = vmul.f32 %v2480_v59, %v2138_v26  ;;  %v2142_v33 = vrot.slane %v2468_v50, %v3797_v49 }
 0x3f5   : > { %2151 = vst [vmem:[%s259_s14] sm:$0xff] %v2143_v39  ;;  %2155 = vst [vmem:[%s259_s14 + $0x20] sm:$0xff] %v2147_v34  ;;  %v2144_v29 = vmul.f32 %v2481_v35, %v2134_v19  ;;  %v2148_v5 = vmul.f32 %v2482_v21, %v2134_v19 }
 0x3f6   : > { %2153 = vst [vmem:[%s259_s14 + $0x10] sm:$0xff] %v2145_v17  ;;  %2157 = vst [vmem:[%s259_s14 + $0x30] sm:$0xff] %v2149_v47  ;;  %v2146_v37 = vmul.f32 %v2483_v18, %v2142_v33  ;;  %v2150_v24 = vmul.f32 %v2484_v3, %v2142_v33 }
 0x3f7   : > { %2152 = vst [vmem:[%s259_s14 + $0x8] sm:$0xff] %v2144_v29  ;;  %2156 = vst [vmem:[%s259_s14 + $0x28] sm:$0xff] %v2148_v5 }
 0x3f8   : > { %2154 = vst [vmem:[%s259_s14 + $0x18] sm:$0xff] %v2146_v37  ;;  %2158 = vst [vmem:[%s259_s14 + $0x38] sm:$0xff] %v2150_v24 }
 0x3f9   : > { %2524 = shalt.err (!%p2521_p0)
}
 0x3fa   : > { %s2525_s9 = scalar_lea.hbm %s3669_s17, 1024  ;;  %s2529_s12 = scalar_lea.hbm %s3724_s6, 2048 }
 0x3fb   : > { %p2526_p1 = scmp.ne.s32.totalorder %s3669_s17, %s2525_s9  ;;  %p2530_p4 = scmp.lt.s32.totalorder %s3669_s17, %s3724_s6 }
 0x3fc   : > { %p2531_p7 = scmp.lt.s32.totalorder %s2529_s12, %s2525_s9 }
 0x3fd   : > { %p2527_p2 = pnand %p2526_p1, %p2659_p5 }
 0x3fe   : > { %p2532_p8 = por %p2531_p7, %p2530_p4 }
 0x3ff   : > { %p2528_p3 = pneg %p2527_p2 }
 0x401   : > { %p2533_p6 = pnand %p2532_p8, %p2528_p3 }
 0x403   : > { %2536 = shalt.err (!%p2533_p6)
}
 0x404   : > { %s2585_s25 = smov 512  }
 0x405   : > { %2359 = dma.vmem_to_hbm [thread:$0]  (%p2659_p5), %s3673_s15, 1024, %s3669_s17, %s3677_s18, %s2585_s25, %s2585_s25, %s2580_s28  }
 0x406 PF: > { %p2371_p9 = scmp.ge.s32.totalorder %s2575_s24, 2  ;;  %s2188_s16 = sand.u32 1, %s2563_s21  }
 0x407   : > { %p3800_p10 = scmp.ne.s32.totalorder %s3744_s8, 0  ;;  %s2189_s19 = scalar_lea.sflag [#allocation4], %s2188_s16 }
 0x409   : > { %p2366_p11 = pnand %p2371_p9, %p3800_p10 }
 0x40b   : > { %p2367_p12 = pneg %p2366_p11 }
 0x40d   : > { %2558 = dma.done.wait (%p2367_p12), %s2189_s19, 1024  }
 0x40e   : > { %2560 = vsyncadd (%p2367_p12), %s2189_s19, 4294966272  ;;  %p17_p13 = scmp.ge.s32.totalorder %s2646_s27, 4   ;;  %s3801_s21 = smov %s2567_s22 }
 0x40f   : > { %s3802_s22 = smov %s2571_s23  ;;  %s3803_s23 = smov %s2657_s30 }
 0x410   : > { %s3804_s24 = smov %s2646_s27  ;;  %19 = sbr.rel (!%p17_p13) target bundleno = 4 (0x4), region = 96 }
 0x415   :  { %2194 = vsyncpa [#allocation3], 1 }
 0x416   :  { %2196 = vsyncpa [#allocation3 + $0x1], 1 }
 0x417   :  { %2197 = vsyncpa [#allocation4], 1 }
 0x418   :  { %2199 = vsyncpa [#allocation4 + $0x1], 1 }

</bundles_post_ra>
